<compile_context>
chip_gen: v7x
topology: tpu7x:2x2x1
jax: 0.10.0
libtpu: 0.0.40
codegen_flags: <defaults>
</compile_context>

<pallas_src>
import functools

import jax
import jax.numpy as jnp
from jax.experimental import pallas as pl
from jax.experimental.pallas import tpu as pltpu

BN_EPS = 1e-5

_VMEM_LIMIT = None


def _get_vmem_limit():
    """96 MiB on 128-MiB-VMEM parts (v5e/v6e), conservative 32 MiB on v7x."""
    global _VMEM_LIMIT
    if _VMEM_LIMIT is None:
        try:
            cap = int(pltpu.get_tpu_info().vmem_capacity_bytes)
        except Exception:
            cap = 0
        _VMEM_LIMIT = 96 * 1024 * 1024 if cap >= 128 * 1024 * 1024 else 32 * 1024 * 1024
    return _VMEM_LIMIT


# ----------------------------------------------------------------------------
# Conv3d kernel: direct (no im2col) channels-last conv with fused BN/residual/ReLU
# ----------------------------------------------------------------------------

def _conv_kernel(*refs, taps, relu, has_residual):
    """One (batch, output-frame) tile of a conv.

    x_ref   : (1, 1, Sp, Cin)   flattened padded input frame (bf16)
    w_ref   : (1, NTAP, Cin, Cout) BN-folded weights for the current temporal tap
    b_ref   : (1, Cout)         folded BN bias (f32)
    res_ref : (1, 1, M, Cout)   optional residual (bf16)
    o_ref   : (1, 1, M, Cout)   output (bf16), resident across the k grid axis
    acc_ref : (M, Cout) f32 scratch accumulator
    """
    if has_residual:
        x_ref, w_ref, b_ref, res_ref, o_ref, acc_ref = refs
    else:
        x_ref, w_ref, b_ref, o_ref, acc_ref = refs
        res_ref = None

    k = pl.program_id(2)

    @pl.when(k == 0)
    def _():
        acc_ref[...] = jnp.zeros_like(acc_ref)

    m = acc_ref.shape[0]
    part = None
    # Spatial taps: static row-offset slices of the frame already in VMEM.
    for s, off in enumerate(taps):
        a = x_ref[0, 0, off:off + m, :]                       # (M, Cin) bf16
        d = jnp.dot(a, w_ref[0, s], preferred_element_type=jnp.float32)
        part = d if part is None else part + d
    acc_ref[...] += part

    @pl.when(k == pl.num_programs(2) - 1)
    def _():
        y = acc_ref[...] + b_ref[...]
        if has_residual:
            y = y + res_ref[0, 0].astype(jnp.float32)
        if relu:
            y = jnp.maximum(y, 0.0)
        o_ref[0, 0] = y.astype(o_ref.dtype)


def _conv_pallas(x, w_taps, bias, m_rows, *, taps, t_stride, relu, residual=None):
    """x: (N, Tin, Sp, Cin) bf16; w_taps: (KT, NTAP, Cin, Cout) bf16;
    bias: (1, Cout) f32; returns (N, To, m_rows, Cout) bf16."""
    N, Tin, Sp, Cin = x.shape
    KT, NTAP, Cin2, Cout = w_taps.shape
    assert Cin == Cin2 and NTAP == len(taps)
    To = (Tin - KT) // t_stride + 1

    in_specs = [
        pl.BlockSpec((1, 1, Sp, Cin),
                     lambda n, t, r, _st=t_stride: (n, t * _st + r, 0, 0)),
        pl.BlockSpec((1, NTAP, Cin, Cout), lambda n, t, r: (r, 0, 0, 0)),
        pl.BlockSpec((1, Cout), lambda n, t, r: (0, 0)),
    ]
    inputs = [x, w_taps, bias]
    has_residual = residual is not None
    if has_residual:
        in_specs.append(pl.BlockSpec((1, 1, m_rows, Cout),
                                     lambda n, t, r: (n, t, 0, 0)))
        inputs.append(residual)

    flops = 2 * N * To * m_rows * Cin * Cout * len(taps) * KT
    bytes_accessed = (x.size * x.dtype.itemsize * KT
                      + w_taps.size * w_taps.dtype.itemsize
                      + N * To * m_rows * Cout * 2
                      + (residual.size * residual.dtype.itemsize if has_residual else 0))

    out = pl.pallas_call(
        functools.partial(_conv_kernel, taps=tuple(int(t) for t in taps),
                          relu=relu, has_residual=has_residual),
        out_shape=jax.ShapeDtypeStruct((N, To, m_rows, Cout), jnp.bfloat16),
        grid_spec=pltpu.PrefetchScalarGridSpec(
            num_scalar_prefetch=0,
            grid=(N, To, KT),                       # reduction (temporal taps) last
            in_specs=in_specs,
            out_specs=pl.BlockSpec((1, 1, m_rows, Cout),
                                   lambda n, t, r: (n, t, 0, 0)),
            scratch_shapes=[pltpu.VMEM((m_rows, Cout), jnp.float32)],
        ),
        compiler_params=pltpu.CompilerParams(
            dimension_semantics=("parallel", "parallel", "arbitrary"),
            vmem_limit_bytes=_get_vmem_limit()),
        cost_estimate=pl.CostEstimate(flops=int(flops), transcendentals=0,
                                      bytes_accessed=int(bytes_accessed)),
    )(*inputs)
    return out


# ----------------------------------------------------------------------------
# Conv wrappers (layout glue only: per-axis halo pad / space-to-depth / reshape)
# ----------------------------------------------------------------------------

def spatial_conv(x, cp, relu=True):
    """(1,kh,kw) conv, spatial stride 1 (or 2 via space-to-depth), pad (0,ph,pw)."""
    N, T, H, W, C = x.shape
    ph, pw = cp['pad']
    xp = jnp.pad(x, ((0, 0), (0, 0), (ph, ph), (pw, pw), (0, 0)))
    if cp['s2d']:
        Hp, Wp = H + 2 * ph, W + 2 * pw
        assert Hp % 2 == 0 and Wp % 2 == 0
        xp = xp.reshape(N, T, Hp // 2, 2, Wp // 2, 2, C)
        xp = xp.transpose(0, 1, 2, 4, 3, 5, 6).reshape(N, T, Hp // 2, Wp // 2, 4 * C)
    KH, KW = cp['keff']
    Hh, Ww = xp.shape[2], xp.shape[3]
    Ho, Wo = Hh - KH + 1, Ww - KW + 1
    if KW > 1:
        # one extra zero row keeps every flattened tap window in bounds
        xp = jnp.pad(xp, ((0, 0), (0, 0), (0, 1), (0, 0), (0, 0)))
    Sp = xp.shape[2] * Ww
    xf = xp.reshape(N, T, Sp, xp.shape[4])
    taps = tuple(dh * Ww + dw for dh in range(KH) for dw in range(KW))
    out = _conv_pallas(xf, cp['w'], cp['b'], Ho * Ww,
                       taps=taps, t_stride=1, relu=relu)
    out = out.reshape(N, T, Ho, Ww, -1)
    if Wo != Ww:
        out = out[:, :, :, :Wo, :]     # drop the flattened-tap garbage columns
    return out


def temporal_conv(x, cp, relu=True, residual=None):
    """(3,1,1) conv, temporal stride 1 or 2, pad (1,0,0); optional fused residual."""
    N, T, H, W, C = x.shape
    xp = jnp.pad(x, ((0, 0), (1, 1), (0, 0), (0, 0), (0, 0)))
    S = H * W
    xf = xp.reshape(N, T + 2, S, C)
    res = None
    if residual is not None:
        res = residual.reshape(residual.shape[0], residual.shape[1], S,
                               residual.shape[4])
    out = _conv_pallas(xf, cp['w'], cp['b'], S, taps=(0,),
                       t_stride=cp['t_stride'], relu=relu, residual=res)
    return out.reshape(out.shape[0], out.shape[1], H, W, -1)


def point_conv(x, cp, relu=False):
    """1x1x1 conv with stride (s,s,s): residual downsample."""
    s = cp['stride']
    if s > 1:
        x = x[:, ::s, ::s, ::s, :]
    N, T, H, W, C = x.shape
    xf = x.reshape(N, T, H * W, C)
    out = _conv_pallas(xf, cp['w'], cp['b'], H * W, taps=(0,),
                       t_stride=1, relu=relu)
    return out.reshape(N, T, H, W, -1)


# ----------------------------------------------------------------------------
# Fused global average pool + classifier
# ----------------------------------------------------------------------------

def _gap_fc_kernel(x_ref, w_ref, b_ref, o_ref, acc_ref, *, inv_s):
    s = pl.program_id(0)

    @pl.when(s == 0)
    def _():
        acc_ref[...] = jnp.zeros_like(acc_ref)

    acc_ref[...] += jnp.sum(x_ref[...].astype(jnp.float32), axis=1)

    @pl.when(s == pl.num_programs(0) - 1)
    def _():
        feats = acc_ref[...] * inv_s                       # (N, C) f32
        o_ref[...] = (jnp.dot(feats, w_ref[...],
                              preferred_element_type=jnp.float32) + b_ref[...])


def gap_fc(x, w, b):
    """AdaptiveAvgPool3d((1,1,1)) + Dropout(eval: identity) + Linear, fused."""
    # TODO(synk): nn.Dropout(0.2) is identity in inference mode; training-mode
    # stochastic dropout is not implemented.
    N, T, H, W, C = x.shape
    S = T * H * W
    x2 = x.reshape(N, S, C)
    if S > 1024:
        sb = 512
        n_s = -(-S // sb)
        pad = n_s * sb - S
        if pad:
            x2 = jnp.pad(x2, ((0, 0), (0, pad), (0, 0)))   # zeros don't change the sum
    else:
        sb, n_s = S, 1
    nc = w.shape[1]
    return pl.pallas_call(
        functools.partial(_gap_fc_kernel, inv_s=1.0 / S),
        out_shape=jax.ShapeDtypeStruct((N, nc), jnp.float32),
        grid_spec=pltpu.PrefetchScalarGridSpec(
            num_scalar_prefetch=0,
            grid=(n_s,),
            in_specs=[pl.BlockSpec((N, sb, C), lambda s: (0, s, 0)),
                      pl.BlockSpec((C, nc), lambda s: (0, 0)),
                      pl.BlockSpec((1, nc), lambda s: (0, 0))],
            out_specs=pl.BlockSpec((N, nc), lambda s: (0, 0)),
            scratch_shapes=[pltpu.VMEM((N, C), jnp.float32)],
        ),
        compiler_params=pltpu.CompilerParams(
            dimension_semantics=("arbitrary",),
            vmem_limit_bytes=_get_vmem_limit()),
    )(x2, w, b)


# ----------------------------------------------------------------------------
# Parameter construction: BN fold + kernel-ready weight layout, done ONCE at init
# ----------------------------------------------------------------------------

def _fold_bn(w, bn):
    gamma, beta, mean, var = bn
    scale = gamma / jnp.sqrt(var + BN_EPS)
    w_f = w * scale[:, None, None, None, None]
    bias = beta - scale * mean
    return w_f, bias


def _prep_spatial(w, bn, stride, pad):
    w_f, bias = _fold_bn(w, bn)
    Cout, Cin, _, kh, kw = w_f.shape
    if stride == 1:
        wt = w_f.transpose(2, 3, 4, 1, 0).reshape(1, kh * kw, Cin, Cout)
        keff, s2d = (kh, kw), False
    else:
        # Space-to-depth rewrite: stride-2 (kh,kw) conv == stride-1 (ceil(kh/2),
        # ceil(kw/2)) conv over 4*Cin interleaved phase channels.
        kqh, kqw = (kh + 1) // 2, (kw + 1) // 2
        wp = jnp.pad(w_f, ((0, 0), (0, 0), (0, 0),
                           (0, 2 * kqh - kh), (0, 2 * kqw - kw)))
        wp = wp.reshape(Cout, Cin, kqh, 2, kqw, 2)
        wp = wp.transpose(2, 4, 3, 5, 1, 0)          # (qh, qw, a, b, Cin, Cout)
        wt = wp.reshape(1, kqh * kqw, 4 * Cin, Cout)
        keff, s2d = (kqh, kqw), True
    return {'w': wt.astype(jnp.bfloat16),
            'b': bias.reshape(1, Cout).astype(jnp.float32),
            'pad': (pad, pad), 'keff': keff, 's2d': s2d}


def _prep_temporal(w, bn, t_stride):
    w_f, bias = _fold_bn(w, bn)
    Cout, Cin, kt, _, _ = w_f.shape
    wt = w_f.transpose(2, 3, 4, 1, 0).reshape(kt, 1, Cin, Cout)
    return {'w': wt.astype(jnp.bfloat16),
            'b': bias.reshape(1, Cout).astype(jnp.float32),
            't_stride': t_stride}


def _prep_point(w, bn, stride):
    w_f, bias = _fold_bn(w, bn)
    Cout, Cin = w_f.shape[0], w_f.shape[1]
    wt = w_f.reshape(Cout, Cin).T.reshape(1, 1, Cin, Cout)
    return {'w': wt.astype(jnp.bfloat16),
            'b': bias.reshape(1, Cout).astype(jnp.float32),
            'stride': stride}


def _conv_w(key, cout, cin, kt, kh, kw):
    fan_in = cin * kt * kh * kw
    return jax.random.normal(key, (cout, cin, kt, kh, kw), jnp.float32) * (2.0 / fan_in) ** 0.5


def _bn_params(key, c):
    k1, k2 = jax.random.split(key)
    gamma = jnp.ones((c,), jnp.float32)
    beta = 0.05 * jax.random.normal(k1, (c,), jnp.float32)
    mean = 0.05 * jax.random.normal(k2, (c,), jnp.float32)
    var = jnp.ones((c,), jnp.float32)
    return gamma, beta, mean, var


def _midplanes(inp, out):
    return (inp * out * 3 * 3 * 3) // (inp * 3 * 3 + 3 * out)


def init_params(key, num_channels=3, num_classes=22):
    # TODO(synk): pretrained torchvision weights are not loadable here;
    # deterministic synthetic weights with the same shapes are used instead.
    def nk():
        nonlocal key
        key, sub = jax.random.split(key)
        return sub

    p = {}
    p['stem1'] = _prep_spatial(_conv_w(nk(), 45, num_channels, 1, 7, 7),
                               _bn_params(nk(), 45), stride=2, pad=3)
    p['stem2'] = _prep_temporal(_conv_w(nk(), 64, 45, 3, 1, 1),
                                _bn_params(nk(), 64), t_stride=1)

    cfg = [(64, 64, 1), (64, 128, 2), (128, 256, 2), (256, 512, 2)]
    p['layers'] = []
    for in_planes, planes, layer_stride in cfg:
        blocks = []
        in_c = in_planes
        for bidx in range(2):
            s = layer_stride if bidx == 0 else 1
            mid = _midplanes(in_c, planes)          # same mid for conv1 and conv2
            blk = {
                'conv1_s': _prep_spatial(_conv_w(nk(), mid, in_c, 1, 3, 3),
                                         _bn_params(nk(), mid), stride=s, pad=1),
                'conv1_t': _prep_temporal(_conv_w(nk(), planes, mid, 3, 1, 1),
                                          _bn_params(nk(), planes), t_stride=s),
                'conv2_s': _prep_spatial(_conv_w(nk(), mid, planes, 1, 3, 3),
                                         _bn_params(nk(), mid), stride=1, pad=1),
                'conv2_t': _prep_temporal(_conv_w(nk(), planes, mid, 3, 1, 1),
                                          _bn_params(nk(), planes), t_stride=1),
            }
            if s != 1 or in_c != planes:
                blk['downsample'] = _prep_point(_conv_w(nk(), planes, in_c, 1, 1, 1),
                                                _bn_params(nk(), planes), stride=s)
            else:
                blk['downsample'] = None
            blocks.append(blk)
            in_c = planes
        p['layers'].append(blocks)

    p['fc_w'] = (jax.random.normal(nk(), (512, num_classes), jnp.float32)
                 * (1.0 / 512.0) ** 0.5)
    p['fc_b'] = 0.01 * jax.random.normal(nk(), (1, num_classes), jnp.float32)
    return p


# ----------------------------------------------------------------------------
# Model forward
# ----------------------------------------------------------------------------

def basic_block(x, blk):
    if blk['downsample'] is not None:
        identity = point_conv(x, blk['downsample'], relu=False)
    else:
        identity = x
    out = spatial_conv(x, blk['conv1_s'], relu=True)
    out = temporal_conv(out, blk['conv1_t'], relu=True)
    out = spatial_conv(out, blk['conv2_s'], relu=True)
    # residual add + final ReLU fused into the epilogue of the last conv
    out = temporal_conv(out, blk['conv2_t'], relu=True, residual=identity)
    return out


def video_model_forward(params, x):
    """VideoModel.forward: x (N, C, T, H, W) -> logits (N, 22)."""
    x = jnp.transpose(x, (0, 2, 3, 4, 1)).astype(jnp.bfloat16)   # channels-last once
    x = spatial_conv(x, params['stem1'], relu=True)
    x = temporal_conv(x, params['stem2'], relu=True)
    for blocks in params['layers']:
        for blk in blocks:
            x = basic_block(x, blk)
    return gap_fc(x, params['fc_w'], params['fc_b'])


if __name__ == "__main__":
    key = jax.random.PRNGKey(0)
    k_x, k_p = jax.random.split(key)

    # Small clip: batch=2, channels=3, frames=4, 16x16 spatial (NCDHW).
    x = jax.random.normal(k_x, (2, 3, 4, 16, 16), jnp.float32)
    params = init_params(k_p, num_channels=3, num_classes=22)

    logits = video_model_forward(params, x)
    logits = jax.block_until_ready(logits)

    assert logits.shape == (2, 22), logits.shape
    assert bool(jnp.all(jnp.isfinite(logits)))
    print("KERNEL_OK")
</pallas_src>

<mosaic_0001>
module attributes {stable_mosaic.version = 11 : i64} {
  func.func @_conv_kernel(%arg0: i32, %arg1: i32, %arg2: i32, %arg3: memref<1x1x132x12xbf16, #tpu.memory_space<vmem>>, %arg4: memref<1x16x12x45xbf16, #tpu.memory_space<vmem>>, %arg5: memref<1x45xf32, #tpu.memory_space<vmem>>, %arg6: memref<1x1x88x45xbf16, #tpu.memory_space<vmem>>, %arg7: memref<88x45xf32, #tpu.memory_space<vmem>>) attributes {dimension_semantics = [#tpu.dimension_semantics<parallel>, #tpu.dimension_semantics<parallel>, #tpu.dimension_semantics<arbitrary>], iteration_bounds = array<i64: 2, 4, 1>, scalar_prefetch = 0 : i64, scratch_operands = 1 : i64, tpu.core_type = #tpu.core_type<tc>, window_params = [{transform_indices = @transform_0, window_bounds = array<i64: 1, 1, 132, 12>}, {transform_indices = @transform_1, window_bounds = array<i64: 1, 16, 12, 45>}, {pipeline_mode = #tpu.pipeline_mode<synchronous>, transform_indices = @transform_2, window_bounds = array<i64: 1, 45>}, {transform_indices = @transform_3, window_bounds = array<i64: 1, 1, 88, 45>}]} {
    %c0_i32 = arith.constant 0 : i32
    %0 = arith.cmpi eq, %arg2, %c0_i32 : i32
    %1 = arith.extui %0 : i1 to i32
    %c0_i32_0 = arith.constant 0 : i32
    %2 = arith.cmpi ne, %1, %c0_i32_0 : i32
    scf.if %2 {
      %cst_126 = arith.constant 0.000000e+00 : f32
      %104 = vector.broadcast %cst_126 : f32 to vector<88x45xf32>
      %c0_127 = arith.constant 0 : index
      %c0_128 = arith.constant 0 : index
      %105 = vector.load %arg7[%c0_127, %c0_128] : memref<88x45xf32, #tpu.memory_space<vmem>>, vector<88x45xf32>
      tpu.vector_store %arg7[%c0_127, %c0_128], %104 {strides = array<i32>} : memref<88x45xf32, #tpu.memory_space<vmem>>, vector<88x45xf32>,
    } else {
    }
    %c0 = arith.constant 0 : index
    %c0_1 = arith.constant 0 : index
    %c0_2 = arith.constant 0 : index
    %c0_3 = arith.constant 0 : index
    %3 = vector.load %arg3[%c0, %c0_1, %c0_2, %c0_3] : memref<1x1x132x12xbf16, #tpu.memory_space<vmem>>, vector<1x1x88x12xbf16>
    %4 = vector.shape_cast %3 : vector<1x1x88x12xbf16> to vector<88x12xbf16>
    %c0_4 = arith.constant 0 : index
    %c0_5 = arith.constant 0 : index
    %c0_6 = arith.constant 0 : index
    %c0_7 = arith.constant 0 : index
    %5 = vector.load %arg4[%c0_4, %c0_5, %c0_6, %c0_7] : memref<1x16x12x45xbf16, #tpu.memory_space<vmem>>, vector<1x1x12x45xbf16>
    %6 = vector.shape_cast %5 : vector<1x1x12x45xbf16> to vector<12x45xbf16>
    %cst = arith.constant dense<0.000000e+00> : vector<88x45xf32>
    %7 = tpu.matmul %4, %6, %cst {dimension_numbers = #tpu.dot_dimension_numbers<[1], [0], [0], [1], [0, 0, 1, 1], [], []>} : vector<88x12xbf16>, vector<12x45xbf16>, vector<88x45xf32> -> vector<88x45xf32>
    %c0_8 = arith.constant 0 : index
    %c0_9 = arith.constant 0 : index
    %c1 = arith.constant 1 : index
    %c0_10 = arith.constant 0 : index
    %8 = vector.load %arg3[%c0_8, %c0_9, %c1, %c0_10] : memref<1x1x132x12xbf16, #tpu.memory_space<vmem>>, vector<1x1x88x12xbf16>
    %9 = vector.shape_cast %8 : vector<1x1x88x12xbf16> to vector<88x12xbf16>
    %c0_11 = arith.constant 0 : index
    %c1_12 = arith.constant 1 : index
    %c0_13 = arith.constant 0 : index
    %c0_14 = arith.constant 0 : index
    %10 = vector.load %arg4[%c0_11, %c1_12, %c0_13, %c0_14] : memref<1x16x12x45xbf16, #tpu.memory_space<vmem>>, vector<1x1x12x45xbf16>
    %11 = vector.shape_cast %10 : vector<1x1x12x45xbf16> to vector<12x45xbf16>
    %cst_15 = arith.constant dense<0.000000e+00> : vector<88x45xf32>
    %12 = tpu.matmul %9, %11, %cst_15 {dimension_numbers = #tpu.dot_dimension_numbers<[1], [0], [0], [1], [0, 0, 1, 1], [], []>} : vector<88x12xbf16>, vector<12x45xbf16>, vector<88x45xf32> -> vector<88x45xf32>
    %13 = arith.addf %7, %12 : vector<88x45xf32>
    %c0_16 = arith.constant 0 : index
    %c0_17 = arith.constant 0 : index
    %c2 = arith.constant 2 : index
    %c0_18 = arith.constant 0 : index
    %14 = vector.load %arg3[%c0_16, %c0_17, %c2, %c0_18] : memref<1x1x132x12xbf16, #tpu.memory_space<vmem>>, vector<1x1x88x12xbf16>
    %15 = vector.shape_cast %14 : vector<1x1x88x12xbf16> to vector<88x12xbf16>
    %c0_19 = arith.constant 0 : index
    %c2_20 = arith.constant 2 : index
    %c0_21 = arith.constant 0 : index
    %c0_22 = arith.constant 0 : index
    %16 = vector.load %arg4[%c0_19, %c2_20, %c0_21, %c0_22] : memref<1x16x12x45xbf16, #tpu.memory_space<vmem>>, vector<1x1x12x45xbf16>
    %17 = vector.shape_cast %16 : vector<1x1x12x45xbf16> to vector<12x45xbf16>
    %cst_23 = arith.constant dense<0.000000e+00> : vector<88x45xf32>
    %18 = tpu.matmul %15, %17, %cst_23 {dimension_numbers = #tpu.dot_dimension_numbers<[1], [0], [0], [1], [0, 0, 1, 1], [], []>} : vector<88x12xbf16>, vector<12x45xbf16>, vector<88x45xf32> -> vector<88x45xf32>
    %19 = arith.addf %13, %18 : vector<88x45xf32>
    %c0_24 = arith.constant 0 : index
    %c0_25 = arith.constant 0 : index
    %c3 = arith.constant 3 : index
    %c0_26 = arith.constant 0 : index
    %20 = vector.load %arg3[%c0_24, %c0_25, %c3, %c0_26] : memref<1x1x132x12xbf16, #tpu.memory_space<vmem>>, vector<1x1x88x12xbf16>
    %21 = vector.shape_cast %20 : vector<1x1x88x12xbf16> to vector<88x12xbf16>
    %c0_27 = arith.constant 0 : index
    %c3_28 = arith.constant 3 : index
    %c0_29 = arith.constant 0 : index
    %c0_30 = arith.constant 0 : index
    %22 = vector.load %arg4[%c0_27, %c3_28, %c0_29, %c0_30] : memref<1x16x12x45xbf16, #tpu.memory_space<vmem>>, vector<1x1x12x45xbf16>
    %23 = vector.shape_cast %22 : vector<1x1x12x45xbf16> to vector<12x45xbf16>
    %cst_31 = arith.constant dense<0.000000e+00> : vector<88x45xf32>
    %24 = tpu.matmul %21, %23, %cst_31 {dimension_numbers = #tpu.dot_dimension_numbers<[1], [0], [0], [1], [0, 0, 1, 1], [], []>} : vector<88x12xbf16>, vector<12x45xbf16>, vector<88x45xf32> -> vector<88x45xf32>
    %25 = arith.addf %19, %24 : vector<88x45xf32>
    %c0_32 = arith.constant 0 : index
    %c0_33 = arith.constant 0 : index
    %c11 = arith.constant 11 : index
    %c0_34 = arith.constant 0 : index
    %26 = vector.load %arg3[%c0_32, %c0_33, %c11, %c0_34] : memref<1x1x132x12xbf16, #tpu.memory_space<vmem>>, vector<1x1x88x12xbf16>
    %27 = vector.shape_cast %26 : vector<1x1x88x12xbf16> to vector<88x12xbf16>
    %c0_35 = arith.constant 0 : index
    %c4 = arith.constant 4 : index
    %c0_36 = arith.constant 0 : index
    %c0_37 = arith.constant 0 : index
    %28 = vector.load %arg4[%c0_35, %c4, %c0_36, %c0_37] : memref<1x16x12x45xbf16, #tpu.memory_space<vmem>>, vector<1x1x12x45xbf16>
    %29 = vector.shape_cast %28 : vector<1x1x12x45xbf16> to vector<12x45xbf16>
    %cst_38 = arith.constant dense<0.000000e+00> : vector<88x45xf32>
    %30 = tpu.matmul %27, %29, %cst_38 {dimension_numbers = #tpu.dot_dimension_numbers<[1], [0], [0], [1], [0, 0, 1, 1], [], []>} : vector<88x12xbf16>, vector<12x45xbf16>, vector<88x45xf32> -> vector<88x45xf32>
    %31 = arith.addf %25, %30 : vector<88x45xf32>
    %c0_39 = arith.constant 0 : index
    %c0_40 = arith.constant 0 : index
    %c12 = arith.constant 12 : index
    %c0_41 = arith.constant 0 : index
    %32 = vector.load %arg3[%c0_39, %c0_40, %c12, %c0_41] : memref<1x1x132x12xbf16, #tpu.memory_space<vmem>>, vector<1x1x88x12xbf16>
    %33 = vector.shape_cast %32 : vector<1x1x88x12xbf16> to vector<88x12xbf16>
    %c0_42 = arith.constant 0 : index
    %c5 = arith.constant 5 : index
    %c0_43 = arith.constant 0 : index
    %c0_44 = arith.constant 0 : index
    %34 = vector.load %arg4[%c0_42, %c5, %c0_43, %c0_44] : memref<1x16x12x45xbf16, #tpu.memory_space<vmem>>, vector<1x1x12x45xbf16>
    %35 = vector.shape_cast %34 : vector<1x1x12x45xbf16> to vector<12x45xbf16>
    %cst_45 = arith.constant dense<0.000000e+00> : vector<88x45xf32>
    %36 = tpu.matmul %33, %35, %cst_45 {dimension_numbers = #tpu.dot_dimension_numbers<[1], [0], [0], [1], [0, 0, 1, 1], [], []>} : vector<88x12xbf16>, vector<12x45xbf16>, vector<88x45xf32> -> vector<88x45xf32>
    %37 = arith.addf %31, %36 : vector<88x45xf32>
    %c0_46 = arith.constant 0 : index
    %c0_47 = arith.constant 0 : index
    %c13 = arith.constant 13 : index
    %c0_48 = arith.constant 0 : index
    %38 = vector.load %arg3[%c0_46, %c0_47, %c13, %c0_48] : memref<1x1x132x12xbf16, #tpu.memory_space<vmem>>, vector<1x1x88x12xbf16>
    %39 = vector.shape_cast %38 : vector<1x1x88x12xbf16> to vector<88x12xbf16>
    %c0_49 = arith.constant 0 : index
    %c6 = arith.constant 6 : index
    %c0_50 = arith.constant 0 : index
    %c0_51 = arith.constant 0 : index
    %40 = vector.load %arg4[%c0_49, %c6, %c0_50, %c0_51] : memref<1x16x12x45xbf16, #tpu.memory_space<vmem>>, vector<1x1x12x45xbf16>
    %41 = vector.shape_cast %40 : vector<1x1x12x45xbf16> to vector<12x45xbf16>
    %cst_52 = arith.constant dense<0.000000e+00> : vector<88x45xf32>
    %42 = tpu.matmul %39, %41, %cst_52 {dimension_numbers = #tpu.dot_dimension_numbers<[1], [0], [0], [1], [0, 0, 1, 1], [], []>} : vector<88x12xbf16>, vector<12x45xbf16>, vector<88x45xf32> -> vector<88x45xf32>
    %43 = arith.addf %37, %42 : vector<88x45xf32>
    %c0_53 = arith.constant 0 : index
    %c0_54 = arith.constant 0 : index
    %c14 = arith.constant 14 : index
    %c0_55 = arith.constant 0 : index
    %44 = vector.load %arg3[%c0_53, %c0_54, %c14, %c0_55] : memref<1x1x132x12xbf16, #tpu.memory_space<vmem>>, vector<1x1x88x12xbf16>
    %45 = vector.shape_cast %44 : vector<1x1x88x12xbf16> to vector<88x12xbf16>
    %c0_56 = arith.constant 0 : index
    %c7 = arith.constant 7 : index
    %c0_57 = arith.constant 0 : index
    %c0_58 = arith.constant 0 : index
    %46 = vector.load %arg4[%c0_56, %c7, %c0_57, %c0_58] : memref<1x16x12x45xbf16, #tpu.memory_space<vmem>>, vector<1x1x12x45xbf16>
    %47 = vector.shape_cast %46 : vector<1x1x12x45xbf16> to vector<12x45xbf16>
    %cst_59 = arith.constant dense<0.000000e+00> : vector<88x45xf32>
    %48 = tpu.matmul %45, %47, %cst_59 {dimension_numbers = #tpu.dot_dimension_numbers<[1], [0], [0], [1], [0, 0, 1, 1], [], []>} : vector<88x12xbf16>, vector<12x45xbf16>, vector<88x45xf32> -> vector<88x45xf32>
    %49 = arith.addf %43, %48 : vector<88x45xf32>
    %c0_60 = arith.constant 0 : index
    %c0_61 = arith.constant 0 : index
    %c22 = arith.constant 22 : index
    %c0_62 = arith.constant 0 : index
    %50 = vector.load %arg3[%c0_60, %c0_61, %c22, %c0_62] : memref<1x1x132x12xbf16, #tpu.memory_space<vmem>>, vector<1x1x88x12xbf16>
    %51 = vector.shape_cast %50 : vector<1x1x88x12xbf16> to vector<88x12xbf16>
    %c0_63 = arith.constant 0 : index
    %c8 = arith.constant 8 : index
    %c0_64 = arith.constant 0 : index
    %c0_65 = arith.constant 0 : index
    %52 = vector.load %arg4[%c0_63, %c8, %c0_64, %c0_65] : memref<1x16x12x45xbf16, #tpu.memory_space<vmem>>, vector<1x1x12x45xbf16>
    %53 = vector.shape_cast %52 : vector<1x1x12x45xbf16> to vector<12x45xbf16>
    %cst_66 = arith.constant dense<0.000000e+00> : vector<88x45xf32>
    %54 = tpu.matmul %51, %53, %cst_66 {dimension_numbers = #tpu.dot_dimension_numbers<[1], [0], [0], [1], [0, 0, 1, 1], [], []>} : vector<88x12xbf16>, vector<12x45xbf16>, vector<88x45xf32> -> vector<88x45xf32>
    %55 = arith.addf %49, %54 : vector<88x45xf32>
    %c0_67 = arith.constant 0 : index
    %c0_68 = arith.constant 0 : index
    %c23 = arith.constant 23 : index
    %c0_69 = arith.constant 0 : index
    %56 = vector.load %arg3[%c0_67, %c0_68, %c23, %c0_69] : memref<1x1x132x12xbf16, #tpu.memory_space<vmem>>, vector<1x1x88x12xbf16>
    %57 = vector.shape_cast %56 : vector<1x1x88x12xbf16> to vector<88x12xbf16>
    %c0_70 = arith.constant 0 : index
    %c9 = arith.constant 9 : index
    %c0_71 = arith.constant 0 : index
    %c0_72 = arith.constant 0 : index
    %58 = vector.load %arg4[%c0_70, %c9, %c0_71, %c0_72] : memref<1x16x12x45xbf16, #tpu.memory_space<vmem>>, vector<1x1x12x45xbf16>
    %59 = vector.shape_cast %58 : vector<1x1x12x45xbf16> to vector<12x45xbf16>
    %cst_73 = arith.constant dense<0.000000e+00> : vector<88x45xf32>
    %60 = tpu.matmul %57, %59, %cst_73 {dimension_numbers = #tpu.dot_dimension_numbers<[1], [0], [0], [1], [0, 0, 1, 1], [], []>} : vector<88x12xbf16>, vector<12x45xbf16>, vector<88x45xf32> -> vector<88x45xf32>
    %61 = arith.addf %55, %60 : vector<88x45xf32>
    %c0_74 = arith.constant 0 : index
    %c0_75 = arith.constant 0 : index
    %c24 = arith.constant 24 : index
    %c0_76 = arith.constant 0 : index
    %62 = vector.load %arg3[%c0_74, %c0_75, %c24, %c0_76] : memref<1x1x132x12xbf16, #tpu.memory_space<vmem>>, vector<1x1x88x12xbf16>
    %63 = vector.shape_cast %62 : vector<1x1x88x12xbf16> to vector<88x12xbf16>
    %c0_77 = arith.constant 0 : index
    %c10 = arith.constant 10 : index
    %c0_78 = arith.constant 0 : index
    %c0_79 = arith.constant 0 : index
    %64 = vector.load %arg4[%c0_77, %c10, %c0_78, %c0_79] : memref<1x16x12x45xbf16, #tpu.memory_space<vmem>>, vector<1x1x12x45xbf16>
    %65 = vector.shape_cast %64 : vector<1x1x12x45xbf16> to vector<12x45xbf16>
    %cst_80 = arith.constant dense<0.000000e+00> : vector<88x45xf32>
    %66 = tpu.matmul %63, %65, %cst_80 {dimension_numbers = #tpu.dot_dimension_numbers<[1], [0], [0], [1], [0, 0, 1, 1], [], []>} : vector<88x12xbf16>, vector<12x45xbf16>, vector<88x45xf32> -> vector<88x45xf32>
    %67 = arith.addf %61, %66 : vector<88x45xf32>
    %c0_81 = arith.constant 0 : index
    %c0_82 = arith.constant 0 : index
    %c25 = arith.constant 25 : index
    %c0_83 = arith.constant 0 : index
    %68 = vector.load %arg3[%c0_81, %c0_82, %c25, %c0_83] : memref<1x1x132x12xbf16, #tpu.memory_space<vmem>>, vector<1x1x88x12xbf16>
    %69 = vector.shape_cast %68 : vector<1x1x88x12xbf16> to vector<88x12xbf16>
    %c0_84 = arith.constant 0 : index
    %c11_85 = arith.constant 11 : index
    %c0_86 = arith.constant 0 : index
    %c0_87 = arith.constant 0 : index
    %70 = vector.load %arg4[%c0_84, %c11_85, %c0_86, %c0_87] : memref<1x16x12x45xbf16, #tpu.memory_space<vmem>>, vector<1x1x12x45xbf16>
    %71 = vector.shape_cast %70 : vector<1x1x12x45xbf16> to vector<12x45xbf16>
    %cst_88 = arith.constant dense<0.000000e+00> : vector<88x45xf32>
    %72 = tpu.matmul %69, %71, %cst_88 {dimension_numbers = #tpu.dot_dimension_numbers<[1], [0], [0], [1], [0, 0, 1, 1], [], []>} : vector<88x12xbf16>, vector<12x45xbf16>, vector<88x45xf32> -> vector<88x45xf32>
    %73 = arith.addf %67, %72 : vector<88x45xf32>
    %c0_89 = arith.constant 0 : index
    %c0_90 = arith.constant 0 : index
    %c33 = arith.constant 33 : index
    %c0_91 = arith.constant 0 : index
    %74 = vector.load %arg3[%c0_89, %c0_90, %c33, %c0_91] : memref<1x1x132x12xbf16, #tpu.memory_space<vmem>>, vector<1x1x88x12xbf16>
    %75 = vector.shape_cast %74 : vector<1x1x88x12xbf16> to vector<88x12xbf16>
    %c0_92 = arith.constant 0 : index
    %c12_93 = arith.constant 12 : index
    %c0_94 = arith.constant 0 : index
    %c0_95 = arith.constant 0 : index
    %76 = vector.load %arg4[%c0_92, %c12_93, %c0_94, %c0_95] : memref<1x16x12x45xbf16, #tpu.memory_space<vmem>>, vector<1x1x12x45xbf16>
    %77 = vector.shape_cast %76 : vector<1x1x12x45xbf16> to vector<12x45xbf16>
    %cst_96 = arith.constant dense<0.000000e+00> : vector<88x45xf32>
    %78 = tpu.matmul %75, %77, %cst_96 {dimension_numbers = #tpu.dot_dimension_numbers<[1], [0], [0], [1], [0, 0, 1, 1], [], []>} : vector<88x12xbf16>, vector<12x45xbf16>, vector<88x45xf32> -> vector<88x45xf32>
    %79 = arith.addf %73, %78 : vector<88x45xf32>
    %c0_97 = arith.constant 0 : index
    %c0_98 = arith.constant 0 : index
    %c34 = arith.constant 34 : index
    %c0_99 = arith.constant 0 : index
    %80 = vector.load %arg3[%c0_97, %c0_98, %c34, %c0_99] : memref<1x1x132x12xbf16, #tpu.memory_space<vmem>>, vector<1x1x88x12xbf16>
    %81 = vector.shape_cast %80 : vector<1x1x88x12xbf16> to vector<88x12xbf16>
    %c0_100 = arith.constant 0 : index
    %c13_101 = arith.constant 13 : index
    %c0_102 = arith.constant 0 : index
    %c0_103 = arith.constant 0 : index
    %82 = vector.load %arg4[%c0_100, %c13_101, %c0_102, %c0_103] : memref<1x16x12x45xbf16, #tpu.memory_space<vmem>>, vector<1x1x12x45xbf16>
    %83 = vector.shape_cast %82 : vector<1x1x12x45xbf16> to vector<12x45xbf16>
    %cst_104 = arith.constant dense<0.000000e+00> : vector<88x45xf32>
    %84 = tpu.matmul %81, %83, %cst_104 {dimension_numbers = #tpu.dot_dimension_numbers<[1], [0], [0], [1], [0, 0, 1, 1], [], []>} : vector<88x12xbf16>, vector<12x45xbf16>, vector<88x45xf32> -> vector<88x45xf32>
    %85 = arith.addf %79, %84 : vector<88x45xf32>
    %c0_105 = arith.constant 0 : index
    %c0_106 = arith.constant 0 : index
    %c35 = arith.constant 35 : index
    %c0_107 = arith.constant 0 : index
    %86 = vector.load %arg3[%c0_105, %c0_106, %c35, %c0_107] : memref<1x1x132x12xbf16, #tpu.memory_space<vmem>>, vector<1x1x88x12xbf16>
    %87 = vector.shape_cast %86 : vector<1x1x88x12xbf16> to vector<88x12xbf16>
    %c0_108 = arith.constant 0 : index
    %c14_109 = arith.constant 14 : index
    %c0_110 = arith.constant 0 : index
    %c0_111 = arith.constant 0 : index
    %88 = vector.load %arg4[%c0_108, %c14_109, %c0_110, %c0_111] : memref<1x16x12x45xbf16, #tpu.memory_space<vmem>>, vector<1x1x12x45xbf16>
    %89 = vector.shape_cast %88 : vector<1x1x12x45xbf16> to vector<12x45xbf16>
    %cst_112 = arith.constant dense<0.000000e+00> : vector<88x45xf32>
    %90 = tpu.matmul %87, %89, %cst_112 {dimension_numbers = #tpu.dot_dimension_numbers<[1], [0], [0], [1], [0, 0, 1, 1], [], []>} : vector<88x12xbf16>, vector<12x45xbf16>, vector<88x45xf32> -> vector<88x45xf32>
    %91 = arith.addf %85, %90 : vector<88x45xf32>
    %c0_113 = arith.constant 0 : index
    %c0_114 = arith.constant 0 : index
    %c36 = arith.constant 36 : index
    %c0_115 = arith.constant 0 : index
    %92 = vector.load %arg3[%c0_113, %c0_114, %c36, %c0_115] : memref<1x1x132x12xbf16, #tpu.memory_space<vmem>>, vector<1x1x88x12xbf16>
    %93 = vector.shape_cast %92 : vector<1x1x88x12xbf16> to vector<88x12xbf16>
    %c0_116 = arith.constant 0 : index
    %c15 = arith.constant 15 : index
    %c0_117 = arith.constant 0 : index
    %c0_118 = arith.constant 0 : index
    %94 = vector.load %arg4[%c0_116, %c15, %c0_117, %c0_118] : memref<1x16x12x45xbf16, #tpu.memory_space<vmem>>, vector<1x1x12x45xbf16>
    %95 = vector.shape_cast %94 : vector<1x1x12x45xbf16> to vector<12x45xbf16>
    %cst_119 = arith.constant dense<0.000000e+00> : vector<88x45xf32>
    %96 = tpu.matmul %93, %95, %cst_119 {dimension_numbers = #tpu.dot_dimension_numbers<[1], [0], [0], [1], [0, 0, 1, 1], [], []>} : vector<88x12xbf16>, vector<12x45xbf16>, vector<88x45xf32> -> vector<88x45xf32>
    %97 = arith.addf %91, %96 : vector<88x45xf32>
    %c0_120 = arith.constant 0 : index
    %c0_121 = arith.constant 0 : index
    %98 = vector.load %arg7[%c0_120, %c0_121] : memref<88x45xf32, #tpu.memory_space<vmem>>, vector<88x45xf32>
    %99 = arith.addf %98, %97 : vector<88x45xf32>
    %c0_122 = arith.constant 0 : index
    %c0_123 = arith.constant 0 : index
    %100 = vector.load %arg7[%c0_122, %c0_123] : memref<88x45xf32, #tpu.memory_space<vmem>>, vector<88x45xf32>
    tpu.vector_store %arg7[%c0_122, %c0_123], %99 {strides = array<i32>} : memref<88x45xf32, #tpu.memory_space<vmem>>, vector<88x45xf32>,
    %c0_i32_124 = arith.constant 0 : i32
    %101 = arith.cmpi eq, %arg2, %c0_i32_124 : i32
    %102 = arith.extui %101 : i1 to i32
    %c0_i32_125 = arith.constant 0 : i32
    %103 = arith.cmpi ne, %102, %c0_i32_125 : i32
    scf.if %103 {
      %c0_126 = arith.constant 0 : index
      %c0_127 = arith.constant 0 : index
      %104 = vector.load %arg7[%c0_126, %c0_127] : memref<88x45xf32, #tpu.memory_space<vmem>>, vector<88x45xf32>
      %c0_128 = arith.constant 0 : index
      %c0_129 = arith.constant 0 : index
      %105 = vector.load %arg5[%c0_128, %c0_129] : memref<1x45xf32, #tpu.memory_space<vmem>>, vector<1x45xf32>
      %106 = vector.broadcast %105 : vector<1x45xf32> to vector<88x45xf32>
      %107 = arith.addf %104, %106 : vector<88x45xf32>
      %cst_130 = arith.constant 0.000000e+00 : f32
      %108 = vector.broadcast %cst_130 : f32 to vector<88x45xf32>
      %109 = arith.maximumf %107, %108 : vector<88x45xf32>
      %110 = arith.truncf %109 : vector<88x45xf32> to vector<88x45xbf16>
      %c0_131 = arith.constant 0 : index
      %c0_132 = arith.constant 0 : index
      %c0_133 = arith.constant 0 : index
      %c0_134 = arith.constant 0 : index
      %111 = vector.load %arg6[%c0_131, %c0_132, %c0_133, %c0_134] : memref<1x1x88x45xbf16, #tpu.memory_space<vmem>>, vector<1x1x88x45xbf16>
      %112 = vector.shape_cast %111 : vector<1x1x88x45xbf16> to vector<88x45xbf16>
      %113 = vector.shape_cast %110 : vector<88x45xbf16> to vector<1x1x88x45xbf16>
      tpu.vector_store %arg6[%c0_131, %c0_132, %c0_133, %c0_134], %113 {strides = array<i32>} : memref<1x1x88x45xbf16, #tpu.memory_space<vmem>>, vector<1x1x88x45xbf16>,
    } else {
    }
    return
  }
  func.func @transform_0(%arg0: i32, %arg1: i32, %arg2: i32) -> (i32, i32, i32, i32) {
    %c1_i32 = arith.constant 1 : i32
    %0 = arith.muli %arg1, %c1_i32 : i32
    %1 = arith.addi %0, %arg2 : i32
    %c0_i32 = arith.constant 0 : i32
    %c0_i32_0 = arith.constant 0 : i32
    %c0_i32_1 = arith.constant 0 : i32
    return %arg0, %1, %c0_i32, %c0_i32_0 : i32, i32, i32, i32
  }
  func.func @transform_1(%arg0: i32, %arg1: i32, %arg2: i32) -> (i32, i32, i32, i32) {
    %c0_i32 = arith.constant 0 : i32
    %c0_i32_0 = arith.constant 0 : i32
    %c0_i32_1 = arith.constant 0 : i32
    %c0_i32_2 = arith.constant 0 : i32
    return %arg2, %c0_i32, %c0_i32_0, %c0_i32_1 : i32, i32, i32, i32
  }
  func.func @transform_2(%arg0: i32, %arg1: i32, %arg2: i32) -> (i32, i32) {
    %c0_i32 = arith.constant 0 : i32
    %c0_i32_0 = arith.constant 0 : i32
    %c0_i32_1 = arith.constant 0 : i32
    return %c0_i32, %c0_i32_0 : i32, i32
  }
  func.func @transform_3(%arg0: i32, %arg1: i32, %arg2: i32) -> (i32, i32, i32, i32) {
    %c0_i32 = arith.constant 0 : i32
    %c0_i32_0 = arith.constant 0 : i32
    %c0_i32_1 = arith.constant 0 : i32
    return %arg0, %arg1, %c0_i32, %c0_i32_0 : i32, i32, i32, i32
  }
}

</mosaic_0001>

<bundles_post_ra>
// kernel: tpu_custom_call.1
= control target key start
LH: loop header
LB: loop body
LE: loop exit
PB: predicated region body
PF: predicated region fallthrough
CT: control target
= control target key end

     0   :  { %s3933_s12 = smov 0   ;;  %s3935_s13 = smov 0   ;;  %s4910_s0 = inlined_call_operand.vmem [shape: bf16[2,4,132,12], index: 0, kind: input, shape index: {}]   ;;  %s4911_s1 = inlined_call_operand.vmem [shape: bf16[1,16,12,45], index: 1, kind: input, shape index: {}]   ;;  %s4912_s2 = inlined_call_operand.vmem [shape: f32[1,45], index: 2, kind: input, shape index: {}]   ;;  %s4913_s3 = inlined_call_operand.vmem [shape: bf16[2,4,88,45], index: 3, kind: output, shape index: {}]  }
   0x1   :  { %s3937_s14 = smov 0   ;;  %s3939_s15 = smov 0  }
   0x2   :  { %s3941_s16 = smov 0  }
   0x3 LB: > { %s28_s17 = sadd.s32 1, %s3902_s14  ;;  %s32_s18 = sadd.s32 1, %s3906_s15  ;;  %s3910_s16 = sphi %s3941_s16, %s13_s16   ;;  %s3906_s15 = sphi %s3939_s15, %s4917_s15   ;;  %s3902_s14 = sphi %s3937_s14, %s4916_s14   ;;  %s3898_s13 = sphi %s3935_s13, %s4915_s13   ;;  %s3894_s12 = sphi %s3933_s12, %s4914_s12  }
   0x4   : > { %p30_p0 = scmp.ge.s32.totalorder %s28_s17, 4  ;;  %p3077_p1 = scmp.ge.s32.totalorder %s3910_s16, 1 }
   0x5   : > { %p178_p2 = scmp.lt.s32.totalorder %s3910_s16, 9 }
   0x6   : > { %s4919_s17 = smov (%p30_p0, %s28_s17), 0  ;;  %s4921_s18 = smov (!%p30_p0, %s32_s18), %s3906_s15 }
   0x7   : > { %p179_p3 = pnand %p3077_p1, %p178_p2  ;;  %p34_p4 = scmp.ge.s32.totalorder %s4921_s18, 2 }
   0x8   : > { %vm377_vm0 = vcmask (!%p179_p3), 1045504   ;;  %p217_p5 = scmp.lt.s32.totalorder (!%p179_p3), %s3898_s13, 1  ;;  %v3810_v0 = vld [vmem:[%s4911_s1 + $0x40] sm:$0x3f] (!%p179_p3)   ;;  %v3811_v1 = vld [vmem:[%s4911_s1 + $0x8] sm:$0x3f] (!%p179_p3)  }
   0x9   : > { %s4923_s18 = smov (%p34_p4, %s4921_s18), 0  ;;  %182 = sbr.rel (%p179_p3) target bundleno = 470 (0x1d6), region = 32 }
   0xa   : > { %3757 = vmatprep.subr.msk.bf16.mxu0 (!%p179_p3), %vm377_vm0, %v3810_v0  ;;  %v1582_v2 = vsel (!%p179_p3), %vm377_vm0, %v3810_v0, 0  ;;  %p219_p6 = scmp.lt.s32.totalorder (!%p179_p3), %s3894_s12, 3  ;;  %3749 = vmatprep.subr.msk.bf16.mxu1 (!%p179_p3), %vm377_vm0, %v3811_v1  ;;  %v379_v3 = vsel (!%p179_p3), %vm377_vm0, %v3811_v1, 0  ;;  %v3818_v4 = vld [vmem:[%s4911_s1] sm:$0x3f] (!%p179_p3)   ;;  %vm358_vm1 = vcmask (!%p179_p3), 97280  }
   0xb   : > { %3518 = vmatpush3.bf16.msra.mxu0 (!%p179_p3), %v1582_v2  ;;  %3406 = vmatpush3.bf16.msra.mxu1 (!%p179_p3), %v379_v3  ;;  %v3826_v5 = vld [vmem:[%s4911_s1 + $0x48] sm:$0x3f] (!%p179_p3)   ;;  %vm1373_vm2 = vcmask (!%p179_p3), 1044480   ;;  %vm305_vm3 = vsmask.f32 (!%p179_p3), 7424  ;;  %v481_v39 = vsel (!%p179_p3), %vm377_vm0, %v3818_v4, 0 }
   0xc   : > { %3750 = vmatprep.subr.msk.bf16.mxu1 (!%p179_p3), %vm377_vm0, %v3818_v4  ;;  %3758 = vmatprep.subr.msk.bf16.mxu0 (!%p179_p3), %vm377_vm0, %v3826_v5  ;;  %v1760_v6 = vsel (!%p179_p3), %vm377_vm0, %v3826_v5, 0  ;;  %v4042_v25 = vld [vmem:[%s4911_s1 + $0x50] sm:$0x3f] (!%p179_p3)   ;;  %vm1682_vm4 = vsmask.f32 (!%p179_p3), 4352  ;;  %vm570_vm6 = vcmask (!%p179_p3), 1046528  }
   0xd   : > { %v4096_v53 = vld [vmem:[%s4911_s1 + $0x10] sm:$0x3f] (!%p179_p3)   ;;  %vm706_vm5 = vsmask.f32 (!%p179_p3), 6400  ;;  %vm1215_vm7 = vsmask.f32 (!%p179_p3), 5376 }
   0xe   : > { %vm246_vm8 = vcmask (!%p179_p3), 367616   ;;  %vm2946_vm9 = vcmask (!%p179_p3), 363520  }
  0x10   : > { %s4925_s13 = smov (!%p217_p5, %s3898_s13), 1  ;;  %s4927_s12 = smov (!%p219_p6, %s3894_s12), 3 }
  0x11   : > { %s3766_s23 = smul.u32 68, %s4925_s13 }
  0x12   : > { %s3765_s28 = smul.u32 17, %s4927_s12 }
  0x13   : > { %s3767_s11 = smul.u32 11, %s4927_s12 }
  0x14   : > { %s223_s29 = sadd.s32 %s3766_s23, %s3765_s28  ;;  %s3768_s19 = smul.u32 44, %s4925_s13 }
  0x15   : > { %s3078_s30 = sshll.u32 %s223_s29, 2 }
  0x16   : > { %s3990_s6 = scalar_lea.vmem %s4910_s0, %s3078_s30  ;;  %s4809_s20 = sadd.s32 %s3768_s19, %s3767_s11 }
  0x17   : > { %v1502_v7 = vld [vmem:[%s3990_s6 + $0x8] sm:$0x8]  ;;  %v3995_v8 = vld [vmem:[%s3990_s6 + $0xc] sm:$0xf]  ;;  %v3998_v9 = vld [vmem:[%s3990_s6 + $0x10] sm:$0xf] }
  0x18   : > { %v4001_v10 = vld [vmem:[%s3990_s6 + $0x14] sm:$0xf]  ;;  %v4004_v11 = vld [vmem:[%s3990_s6 + $0x18] sm:$0xf]  ;;  %v4007_v12 = vcombine.low %v1502_v7, %v3995_v8  ;;  %v4010_v13 = vld [vmem:[%s3990_s6 + $0x1c] sm:$0xf] }
  0x19   : > { %v4014_v14 = vcombine.low %v3998_v9, %v4001_v10  ;;  %v4018_v15 = vcombine.low %v4004_v11, %v4010_v13  ;;  %v258_v16 = vld [vmem:[%s3990_s6] sm:$0xf]  ;;  %v4022_v17 = vld [vmem:[%s3990_s6 + $0x4] sm:$0xf]  ;;  %v4029_v20 = vld [vmem:[%s3990_s6 + $0x8] sm:$0xff]   ;;  %s3079_s13 = sshll.u32 %s4809_s20, 2 }
  0x1a   : > { %v1547_v18 = vrot.slane %v4007_v12, 3  ;;  %v4026_v19 = vcombine.low %v258_v16, %v4022_v17  ;;  %v4034_v23 = vld [vmem:[%s3990_s6 + $0x10] sm:$0xff]   ;;  %v4037_v24 = vld [vmem:[%s3990_s6 + $0x18] sm:$0xff]   ;;  %v314_v28 = vshll.u32 %v4029_v20, 16  ;;  %v318_v29 = vshrl.u32 %v4029_v20, 16  ;;  %v4080_v44 = vld [vmem:[%s3990_s6 + $0x20] sm:$0xff]   ;;  %s4832_s24 = scalar_lea.vmem %s4913_s3, %s3079_s13 }
  0x1b   : > { %v1548_v21 = vrot.slane %v4014_v14, 3  ;;  %v1550_v22 = vrot.slane %v4018_v15, 3  ;;  %v4049_v30 = vld [vmem:[%s3990_s6 + $0x20] sm:$0xf]  ;;  %v322_v33 = vshll.u32 %v4034_v23, 16  ;;  %v326_v36 = vshrl.u32 %v4034_v23, 16 }
  0x1c   : > { %v307_v26 = vshrl.u32 %v4026_v19, 16  ;;  %v309_v27 = vshll.u32 %v4026_v19, 16  ;;  %v4055_v34 = vld [vmem:[%s3990_s6 + $0x24] sm:$0xf]  ;;  %v4058_v35 = vld [vmem:[%s3990_s6 + $0x28] sm:$0xf] }
  0x1d   : > { %v1549_v31 = vsel %vm1373_vm2, %v1547_v18, %v1548_v21  ;;  %v1551_v32 = vsel %vm1373_vm2, %v1548_v21, %v1550_v22  ;;  %v316_v38 = vrot.slane %v314_v28, 1  ;;  %v4067_v40 = vcombine.low %v4049_v30, %v4055_v34  ;;  %v4070_v41 = vld [vmem:[%s3990_s6 + $0x2c] sm:$0xf]  ;;  %v4091_v52 = vld [vmem:[%s3990_s6 + $0x30] sm:$0xf] }
  0x1e   : > { %3519 = vmatprep.mubr.msk.bf16.mxu0 %vm358_vm1, %v1549_v31  ;;  %v311_v37 = vrot.slane %v309_v27, 1  ;;  %v324_v42 = vrot.slane %v322_v33, 1  ;;  %v4077_v43 = vcombine.low %v4058_v35, %v4070_v41  ;;  %v330_v48 = vshll.u32 %v4037_v24, 16  ;;  %v1513_v58 = vld [vmem:[%s3990_s6 + $0x34] sm:$0x7] }
  0x1f   : > { %3520 = vmatmul.mubr.msk.bf16.vlgmr.msra.gmra.mrb[0].mxu0 %vm358_vm1, %v1551_v32  ;;  %v320_v46 = vor.u32 %v318_v29, %v316_v38  ;;  %v1552_v47 = vrot.slane %v4067_v40, 3  ;;  %v334_v51 = vshrl.u32 %v4037_v24, 16  ;;  %v4107_v59 = vld [vmem:[%s3990_s6 + $0x28] sm:$0xf]  ;;  %v338_v61 = vshll.u32 %v4080_v44, 16 }
  0x20   : > { %v312_v45 = vor.u32 %v311_v37, %v307_v26  ;;  %3532 = vmatpush3.bf16.msra.mxu0 %v1760_v6  ;;  %v1554_v49 = vrot.slane %v4077_v43, 3  ;;  %v328_v50 = vor.u32 %v326_v36, %v324_v42  ;;  %v332_v57 = vrot.slane %v330_v48, 1  ;;  %v271_v63 = vld [vmem:[%s3990_s6 + $0x2c] sm:$0x1]  ;;  %v4139_v32 = vld [vmem:[%s3990_s6 + $0x34] sm:$0xf] }
  0x21   : > { %3759 = vmatprep.subr.msk.bf16.mxu0 %vm377_vm0, %v4042_v25  ;;  %v325_v55 = vsel %vm305_vm3, %v320_v46, %v324_v42  ;;  %v1553_v56 = vsel %vm1373_vm2, %v1550_v22, %v1552_v47  ;;  %v3175_v62 = vcombine.low %v4091_v52, %v1513_v58  ;;  %v342_v0 = vshrl.u32 %v4080_v44, 16 }
  0x22   : > { %v317_v54 = vsel %vm305_vm3, %v312_v45, %v316_v38  ;;  %3523 = vmatprep.mubr.msk.bf16.mxu0 %vm358_vm1, %v1553_v56  ;;  %v1555_v60 = vsel %vm1373_vm2, %v1552_v47, %v1554_v49  ;;  %v333_v1 = vsel %vm305_vm3, %v328_v50, %v332_v57  ;;  %v336_v2 = vor.u32 %v334_v51, %v332_v57 }
  0x23   : > { %3407 = vmatprep.mubr.msk.bf16.mxu1 %vm358_vm1, %v317_v54  ;;  %v4121_v3 = vcombine.low %v4107_v59, %v271_v63  ;;  %v1684_v4 = vshrl.u32 %v4007_v12, 16  ;;  %v340_v5 = vrot.slane %v338_v61, 1  ;;  %v1556_v6 = vrot.slane %v3175_v62, 3 }
  0x24   : > { %3408 = vmatmul.mubr.msk.bf16.vlgmr.msra.gmra.mrb[0].mxu1 %vm358_vm1, %v325_v55  ;;  %v1687_v7 = vshll.u32 %v4007_v12, 16  ;;  %v1692_v16 = vshrl.u32 %v4014_v14, 16  ;;  %v1695_v22 = vshll.u32 %v4014_v14, 16  ;;  %v1704_v45 = vshll.u32 %v4018_v15, 16 }
  0x25   : > { %3420 = vmatpush3.bf16.msra.mxu1 %v481_v39  ;;  %3411 = vmatprep.mubr.msk.bf16.mxu1 %vm358_vm1, %v333_v1  ;;  %v346_v18 = vshll.u32 %v4121_v3, 16  ;;  %v1686_v21 = vrot.slane %v1684_v4, 3  ;;  %v341_v26 = vsel %vm305_vm3, %v336_v2, %v340_v5  ;;  %v1557_v27 = vsel %vm1373_vm2, %v1554_v49, %v1556_v6 }
  0x26   : > { %3751 = vmatprep.subr.msk.bf16.mxu1 %vm377_vm0, %v4096_v53  ;;  %v344_v31 = vor.u32 %v342_v0, %v340_v5  ;;  %v1689_v12 = vrot.slane %v1687_v7, 4  ;;  %v1694_v38 = vrot.slane %v1692_v16, 3  ;;  %v1697_v14 = vrot.slane %v1695_v22, 4  ;;  %v3840_v5 = vld [vmem:[%s3990_s6 + $0x14] sm:$0xff]   ;;  %v3841_v16 = vld [vmem:[%s3990_s6 + $0x1c] sm:$0xff]  }
  0x27   : > { %3524 = vmatmul.mubr.msk.bf16.gmra.mrb[4].mxu0 %vm358_vm1, %v1555_v60  ;;  %v348_v37 = vrot.slane %v346_v18, 1  ;;  %v1701_v39 = vshrl.u32 %v4018_v15, 16  ;;  %v1710_v46 = vshrl.u32 %v4067_v40, 16  ;;  %v1713_v47 = vshll.u32 %v4067_v40, 16 }
  0x28   : > { %3527 = vmatprep.mubr.msk.bf16.mxu0 %vm358_vm1, %v1557_v27  ;;  %v1690_v42 = vor.u32 %v1689_v12, %v1686_v21  ;;  %v1698_v50 = vor.u32 %v1697_v14, %v1694_v38  ;;  %v350_v54 = vshrl.u32 %v4121_v3, 16  ;;  %v1706_v56 = vrot.slane %v1704_v45, 4  ;;  %v4170_v27 = vld [vmem:[%s4911_s1 + $0x58] sm:$0x3f]   ;;  %v3843_v38 = vld [vmem:[%s3990_s6 + $0x24] sm:$0xff]  }
  0x29   : > { %v349_v49 = vsel %vm305_vm3, %v344_v31, %v348_v37  ;;  %v1703_v55 = vrot.slane %v1701_v39, 3  ;;  %v3185_v57 = vcombine.low %v4091_v52, %v4139_v32  ;;  %v1712_v40 = vrot.slane %v1710_v46, 3 }
  0x2a   : > { %v1699_v15 = vsel %vm1682_vm4, %v1690_v42, %v1698_v50  ;;  %v1715_v58 = vrot.slane %v1713_v47, 4  ;;  %v1719_v60 = vshrl.u32 %v4077_v43, 16  ;;  %v1722_v62 = vshll.u32 %v4077_v43, 16  ;;  %v3844_v42 = vld [vmem:[%s3990_s6 + $0x2c] sm:$0xff]  }
  0x2b   : > { %v352_v63 = vor.u32 %v350_v54, %v348_v37  ;;  %v1707_v1 = vor.u32 %v1706_v56, %v1703_v55  ;;  %v1728_v2 = vshrl.u32 %v3185_v57, 16  ;;  %v1731_v4 = vshll.u32 %v3185_v57, 16 }
  0x2c   : > { %3412 = vmatmul.mubr.msk.bf16.gmra.mrb[4].mxu1 %vm358_vm1, %v341_v26  ;;  %v1716_v7 = vor.u32 %v1715_v58, %v1712_v40  ;;  %v716_v18 = vrot.slane %v314_v28, 2  ;;  %v1721_v21 = vrot.slane %v1719_v60, 3  ;;  %v1724_v22 = vrot.slane %v1722_v62, 4  ;;  %v699_v58 = vld [vmem:[%s3990_s6 + $0x2c] sm:$0x3] }
  0x2d   : > { %3415 = vmatprep.mubr.msk.bf16.mxu1 %vm358_vm1, %v349_v49  ;;  %v1886_v43 = vsel %vm377_vm0, %v4042_v25, 0  ;;  %v719_v26 = vrot.slane %v326_v36, 1  ;;  %v1708_v28 = vsel %vm1682_vm4, %v1698_v50, %v1707_v1  ;;  %v1730_v31 = vrot.slane %v1728_v2, 3  ;;  %v4195_v50 = vld [vmem:[%s3990_s6 + $0x34] sm:$0x1f]  }
  0x2e   : > { %v1733_v12 = vrot.slane %v1731_v4, 4  ;;  %v1717_v25 = vsel %vm1682_vm4, %v1707_v1, %v1716_v7  ;;  %v2036_v37 = vshrl.u32 %v3840_v5, 16  ;;  %v2040_v36 = vshll.u32 %v3841_v16, 16  ;;  %v2188_v2 = vld [vmem:[%s3990_s6 + $0x10] sm:$0xf] }
  0x2f   : > { %3528 = vmatmul.mubr.msk.bf16.gmra.mrb[8].mxu0 %vm358_vm1, %v1556_v6  ;;  %v720_v6 = vrot.slane %v322_v33, 2  ;;  %v2032_v33 = vshll.u32 %v3840_v5, 16  ;;  %v606_v14 = vsel %vm377_vm0, %v4096_v53, 0  ;;  %v1725_v39 = vor.u32 %v1724_v22, %v1721_v21  ;;  %v4192_v53 = vld [vmem:[%s4911_s1 + $0x18] sm:$0x3f]  }
  0x30   : > { %3533 = vmatprep.mubr.msk.bf16.mxu0 %vm358_vm1, %v1699_v15  ;;  %v2042_v46 = vrot.slane %v2040_v36, 1  ;;  %v4187_v49 = vor.u32 %v1733_v12, %v1730_v31  ;;  %v2044_v55 = vshrl.u32 %v3841_v16, 16  ;;  %v2048_v56 = vshll.u32 %v3843_v38, 16  ;;  %v4213_v4 = vld [vmem:[%s3990_s6 + $0x14] sm:$0xf]  ;;  %v4224_v21 = vld [vmem:[%s3990_s6 + $0x18] sm:$0xff]  }
  0x31   : > { %v4182_v45 = vrot.slane %v2032_v33, 1  ;;  %v721_v47 = vor.u32 %v720_v6, %v719_v26  ;;  %v1726_v57 = vsel %vm1682_vm4, %v1716_v7, %v1725_v39  ;;  %v2052_v15 = vshrl.u32 %v3843_v38, 16  ;;  %v563_v31 = vld [vmem:[%s3990_s6] sm:$0xe] }
  0x32   : > { %v2056_v40 = vshll.u32 %v3844_v42, 16  ;;  %v2050_v1 = vrot.slane %v2048_v56, 1  ;;  %v1735_v5 = vsel %vm1682_vm4, %v1725_v39, %v4187_v49  ;;  %v723_v16 = vrot.slane %v334_v51, 1  ;;  %v4252_v38 = vld [vmem:[%s3990_s6 + $0x20] sm:$0xff]  }
  0x33   : > { %v727_v6 = vrot.slane %v342_v0, 1  ;;  %v728_v51 = vrot.slane %v338_v61, 2  ;;  %v2060_v26 = vshrl.u32 %v3844_v42, 16  ;;  %v3115_v0 = vcombine.low %v4107_v59, %v699_v58 }
  0x34   : > { %3416 = vmatmul.mubr.msk.bf16.gmra.mrb[8].mxu1 %vm358_vm1, %v352_v63  ;;  %v2046_v63 = vor.u32 %v2044_v55, %v2042_v46  ;;  %v2058_v7 = vrot.slane %v2056_v40, 1  ;;  %v3225_v36 = vcombine.low %v2188_v2, %v4213_v4  ;;  %v2245_v40 = vshrl.u32 %v4224_v21, 16 }
  0x35   : > { %3421 = vmatprep.mubr.msk.bf16.mxu1 %vm358_vm1, %v4026_v19  ;;  %v715_v19 = vrot.slane %v318_v29, 1  ;;  %v2038_v29 = vor.u32 %v2036_v37, %v4182_v45  ;;  %v732_v39 = vshrl.u32 %v3115_v0, 16  ;;  %v735_v42 = vshll.u32 %v3115_v0, 16  ;;  %v4314_v0 = vld [vmem:[%s3990_s6 + $0x38] sm:$0xf] }
  0x36   : > { %v4229_v22 = vsel %vm305_vm3, %v2046_v63, %v2050_v1  ;;  %v2062_v33 = vor.u32 %v2060_v26, %v2058_v7  ;;  %v2236_v55 = vshll.u32 %v3225_v36, 16  ;;  %v2249_v63 = vshll.u32 %v4252_v38, 16 }
  0x37   : > { %3534 = vmatmul.mubr.msk.bf16.vlgmr.msra.gmra.mrb[0].mxu0 %vm358_vm1, %v1708_v28  ;;  %v4200_v54 = vor.u32 %v716_v18, %v715_v19  ;;  %v4205_v60 = vsel %vm305_vm3, %v2038_v29, %v2042_v46  ;;  %v724_v18 = vrot.slane %v330_v48, 2  ;;  %v2064_v28 = vshll.u32 %v4195_v50, 16 }
  0x38   : > { %3537 = vmatprep.mubr.msk.bf16.mxu0 %vm358_vm1, %v1717_v25  ;;  %3546 = vmatpush3.bf16.msra.mxu0 %v1886_v43  ;;  %v2054_v43 = vor.u32 %v2052_v15, %v2050_v1  ;;  %v729_v25 = vor.u32 %v728_v51, %v727_v6  ;;  %v2241_v46 = vshll.u32 %v4224_v21, 16  ;;  %v4259_v19 = vcombine.low %v563_v31, %v4022_v17 }
  0x39   : > { %3760 = vmatprep.subr.msk.bf16.mxu0 %vm377_vm0, %v4170_v27  ;;  %v4209_v62 = vsel %vm706_vm5, %v4200_v54, %v721_v47  ;;  %v725_v48 = vor.u32 %v724_v18, %v723_v16  ;;  %v4248_v37 = vrot.slane %v2064_v28, 1  ;;  %v2234_v29 = vshrl.u32 %v3225_v36, 16 }
  0x3a   : > { %v4241_v12 = vsel %vm305_vm3, %v2054_v43, %v2058_v7  ;;  %v734_v56 = vrot.slane %v732_v39, 1  ;;  %v2243_v15 = vrot.slane %v2241_v46, 1  ;;  %v3195_v17 = vcombine.low %v3995_v8, %v3998_v9  ;;  %v4284_v8 = vld [vmem:[%s3990_s6 + $0x28] sm:$0xff]   ;;  %v4287_v9 = vld [vmem:[%s3990_s6 + $0x30] sm:$0xff]  }
  0x3b   : > { %v4246_v61 = vsel %vm706_vm5, %v721_v47, %v725_v48  ;;  %v4263_v47 = vsel %vm305_vm3, %v2062_v33, %v4248_v37  ;;  %v2238_v58 = vrot.slane %v2236_v55, 1  ;;  %v572_v7 = vrot.slane %v4029_v20, 1  ;;  %v2199_v33 = vld [vmem:[%s3990_s6 + $0x3c] sm:$0x1]  ;;  %v4332_v55 = vld [vmem:[%s4911_s1 + $0x60] sm:$0x3f]  }
  0x3c   : > { %3422 = vmatmul.mubr.msk.bf16.vlgmr.msra.gmra.mrb[0].mxu1 %vm358_vm1, %v4029_v20  ;;  %v2247_v2 = vor.u32 %v2245_v40, %v2243_v15  ;;  %v2251_v18 = vrot.slane %v2249_v63, 1  ;;  %v3095_v20 = vcombine.low %v4107_v59, %v4107_v59  ;;  %v2257_v26 = vshll.u32 %v4284_v8, 16 }
  0x3d   : > { %3434 = vmatpush3.bf16.msra.mxu1 %v606_v14  ;;  %3425 = vmatprep.mubr.msk.bf16.mxu1 %vm358_vm1, %v4034_v23  ;;  %v4255_v14 = vsel %vm706_vm5, %v725_v48, %v729_v25  ;;  %v2239_v16 = vor.u32 %v2238_v58, %v2234_v29  ;;  %v2253_v48 = vshrl.u32 %v4252_v38, 16  ;;  %v2261_v28 = vshrl.u32 %v4284_v8, 16  ;;  %v3839_v29 = vld [vmem:[%s3990_s6 + $0xc] sm:$0xff]  }
  0x3e   : > { %3752 = vmatprep.subr.msk.bf16.mxu1 %vm377_vm0, %v4192_v53  ;;  %v4302_v51 = vsel %vm305_vm3, %v2247_v2, %v2251_v18  ;;  %v2265_v31 = vshll.u32 %v4287_v9, 16  ;;  %v3196_v59 = vcombine.low %v4001_v10, %v4004_v11  ;;  %v3197_v36 = vcombine.low %v4010_v13, %v4049_v30 }
  0x3f   : > { %3538 = vmatmul.mubr.msk.bf16.gmra.mrb[4].mxu0 %vm358_vm1, %v1726_v57  ;;  %v737_v57 = vrot.slane %v735_v42, 2  ;;  %v4299_v6 = vsel %vm305_vm3, %v2239_v16, %v2243_v15  ;;  %v2259_v39 = vrot.slane %v2257_v26, 1  ;;  %v574_v10 = vrot.slane %v4034_v23, 1 }
  0x40   : > { %3541 = vmatprep.mubr.msk.bf16.mxu0 %vm358_vm1, %v1735_v5  ;;  %v571_v5 = vrot.slane %v4259_v19, 1  ;;  %v2267_v42 = vrot.slane %v2265_v31, 1  ;;  %v2095_v11 = vsel %vm377_vm0, %v4170_v27, 0  ;;  %v576_v13 = vrot.slane %v4037_v24, 1  ;;  %v2397_v27 = vld [vmem:[%s3990_s6 + $0x10] sm:$0xe] }
  0x41   : > { %v4275_v1 = vor.u32 %v737_v57, %v734_v56  ;;  %v2263_v56 = vor.u32 %v2261_v28, %v2259_v39  ;;  %v4341_v57 = vcombine.low %v4314_v0, %v2199_v33  ;;  %v2269_v23 = vshrl.u32 %v4287_v9, 16 }
  0x42   : > { %v764_v58 = vsel %vm377_vm0, %v4192_v53, 0  ;;  %v2027_v2 = vshll.u32 %v3839_v29, 16  ;;  %v577_v16 = vsel %vm570_vm6, %v574_v10, %v576_v13  ;;  %v2405_v53 = vrot.slane %v4224_v21, 1 }
  0x43   : > { %v4293_v43 = vsel %vm706_vm5, %v729_v25, %v4275_v1  ;;  %v2255_v25 = vor.u32 %v2253_v48, %v2251_v18  ;;  %v4348_v15 = vsel %vm305_vm3, %v2263_v56, %v2267_v42  ;;  %v4362_v18 = vld [vmem:[%s4911_s1 + $0x20] sm:$0x3f]   ;;  %v3199_v33 = vcombine.low %v4070_v41, %v4091_v52 }
  0x44   : > { %3426 = vmatmul.mubr.msk.bf16.gmra.mrb[4].mxu1 %vm358_vm1, %v4037_v24  ;;  %v2273_v24 = vshll.u32 %v4341_v57, 16  ;;  %v2409_v52 = vrot.slane %v4284_v8, 1  ;;  %v3200_v56 = vcombine.low %v4139_v32, %v4139_v32 }
  0x45   : > { %3429 = vmatprep.mubr.msk.bf16.mxu1 %vm358_vm1, %v4080_v44  ;;  %v4336_v30 = vsel %vm305_vm3, %v2255_v25, %v2259_v39  ;;  %v578_v25 = vrot.slane %v4080_v44, 1  ;;  %v708_v44 = vshrl.u32 %v4259_v19, 16 }
  0x47   : > { %3542 = vmatmul.mubr.msk.bf16.gmra.mrb[12].mxu0 %vm358_vm1, %v4187_v49  ;;  %v573_v49 = vsel %vm570_vm6, %v571_v5, %v572_v7  ;;  %v2271_v5 = vor.u32 %v2269_v23, %v2267_v42  ;;  %v580_v42 = vrot.slane %v4121_v3, 1  ;;  %v2411_v3 = vrot.slane %v4287_v9, 1 }
  0x48   : > { %3547 = vmatprep.mubr.msk.bf16.mxu0 %vm358_vm1, %v3195_v17  ;;  %v575_v17 = vsel %vm570_vm6, %v572_v7, %v574_v10  ;;  %v3240_v7 = vcombine.low %v2397_v27, %v4213_v4 }
  0x49   : > { %v581_v27 = vsel %vm570_vm6, %v578_v25, %v580_v42 }
  0x4a   : > { %v2404_v39 = vrot.slane %v3240_v7, 1 }
  0x4c   : > { %3430 = vmatmul.mubr.msk.bf16.gmra.mrb[12].mxu1 %vm358_vm1, %v3095_v20  ;;  %v4364_v20 = vrot.slane %v2273_v24, 1  ;;  %v4389_v41 = vsel %vm570_vm6, %v2404_v39, %v2405_v53 }
  0x4d   : > { %3435 = vmatprep.mubr.msk.bf16.mxu1 %vm358_vm1, %v573_v49  ;;  %v3198_v49 = vcombine.low %v4055_v34, %v4058_v35  ;;  %v2025_v34 = vshrl.u32 %v3839_v29, 16  ;;  %v2029_v35 = vrot.slane %v2027_v2, 1  ;;  %v579_v29 = vsel %vm570_vm6, %v576_v13, %v578_v25 }
  0x4e   : > { %v710_v2 = vrot.slane %v708_v44, 1  ;;  %v2551_v13 = vrot.slane %v2253_v48, 1  ;;  %v2552_v25 = vrot.slane %v2249_v63, 2 }
  0x4f   : > { %3548 = vmatmul.mubr.msk.bf16.vlgmr.msra.gmra.mrb[0].mxu0 %vm358_vm1, %v3196_v59  ;;  %v2407_v59 = vrot.slane %v4252_v38, 1  ;;  %v2030_v24 = vor.u32 %v2029_v35, %v2025_v34  ;;  %v2555_v35 = vrot.slane %v2261_v28, 1  ;;  %v2560_v28 = vrot.slane %v2265_v31, 2  ;;  %v4461_v31 = vld [vmem:[%s4911_s1 + $0x68] sm:$0x3f]  }
  0x50   : > { %3551 = vmatprep.mubr.msk.bf16.mxu0 %vm358_vm1, %v3197_v36  ;;  %3560 = vmatpush3.bf16.msra.mxu0 %v2095_v11  ;;  %v4377_v36 = vsel %vm305_vm3, %v2271_v5, %v4364_v20  ;;  %v711_v11 = vshll.u32 %v4259_v19, 16  ;;  %v2413_v19 = vrot.slane %v4341_v57, 1  ;;  %v2553_v34 = vor.u32 %v2552_v25, %v2551_v13 }
  0x51   : > { %3761 = vmatprep.subr.msk.bf16.mxu0 %vm377_vm0, %v4332_v55  ;;  %v4382_v10 = vsel %vm570_vm6, %v2405_v53, %v2407_v59  ;;  %v2543_v53 = vshll.u32 %v3240_v7, 16  ;;  %v2035_v48 = vsel %vm305_vm3, %v2030_v24, %v4182_v45  ;;  %v857_v45 = vld [vmem:[%s3990_s6 + $0x4] sm:$0xe] }
  0x52   : > { %v713_v5 = vrot.slane %v711_v11, 2  ;;  %v4411_v32 = vsel %vm570_vm6, %v2411_v3, %v2413_v19  ;;  %v2556_v11 = vrot.slane %v2257_v26, 2 }
  0x54   : > { %3436 = vmatmul.mubr.msk.bf16.vlgmr.msra.gmra.mrb[0].mxu1 %vm358_vm1, %v575_v17  ;;  %v4401_v17 = vsel %vm570_vm6, %v2407_v59, %v2409_v52  ;;  %v2548_v59 = vrot.slane %v2241_v46, 2  ;;  %v2557_v24 = vor.u32 %v2556_v11, %v2555_v35  ;;  %v4499_v35 = vld [vmem:[%s4911_s1 + $0x28] sm:$0x3f]  }
  0x55   : > { %3448 = vmatpush3.bf16.msra.mxu1 %v764_v58  ;;  %3439 = vmatprep.mubr.msk.bf16.mxu1 %vm358_vm1, %v577_v16  ;;  %v4404_v58 = vsel %vm570_vm6, %v2409_v52, %v2411_v3  ;;  %v2540_v16 = vshrl.u32 %v3240_v7, 16  ;;  %v2532_v52 = vld [vmem:[%s3990_s6 + $0x3c] sm:$0x3] }
  0x56   : > { %3753 = vmatprep.subr.msk.bf16.mxu1 %vm377_vm0, %v4362_v18 }
  0x57   : > { %3552 = vmatmul.mubr.msk.bf16.gmra.mrb[4].mxu0 %vm358_vm1, %v3198_v49  ;;  %v2547_v49 = vrot.slane %v2245_v40, 1  ;;  %v2542_v7 = vrot.slane %v2540_v16, 1  ;;  %v714_v40 = vor.u32 %v713_v5, %v710_v2  ;;  %v4449_v2 = vld [vmem:[%s3990_s6 + $0xc] sm:$0xff]   ;;  %v4452_v5 = vcombine.low %v4314_v0, %v2532_v52 }
  0x58   : > { %3555 = vmatprep.mubr.msk.bf16.mxu0 %vm358_vm1, %v3199_v33  ;;  %v2545_v33 = vrot.slane %v2543_v53, 2  ;;  %v979_v53 = vsel %vm377_vm0, %v4362_v18, 0  ;;  %v914_v18 = vshll.u32 %v4449_v2, 16  ;;  %v1375_v11 = vrot.slane %v4449_v2, 3 }
  0x59   : > { %v2549_v39 = vor.u32 %v2548_v59, %v2547_v49  ;;  %v718_v3 = vsel %vm706_vm5, %v714_v40, %v4200_v54  ;;  %v2304_v54 = vsel %vm377_vm0, %v4332_v55, 0  ;;  %v2564_v16 = vshrl.u32 %v4452_v5, 16  ;;  %v1366_v55 = vld [vmem:[%s3990_s6 + $0x4] sm:$0x8]  ;;  %v4477_v49 = vld [vmem:[%s3990_s6 + $0x14] sm:$0xff]   ;;  %v4488_v40 = vld [vmem:[%s3990_s6 + $0x1c] sm:$0xff]  }
  0x5a   : > { %v2546_v46 = vor.u32 %v2545_v33, %v2542_v7  ;;  %v2567_v59 = vshll.u32 %v4452_v5, 16  ;;  %v1208_v7 = vld [vmem:[%s3990_s6 + $0x30] sm:$0x7]  ;;  %v2697_v33 = vrot.slane %v4224_v21, 2  ;;  %v867_v21 = vld [vmem:[%s3990_s6 + $0x2c] sm:$0xf] }
  0x5b   : > { %v4426_v63 = vsel %vm706_vm5, %v2549_v39, %v2553_v34  ;;  %v1377_v52 = vrot.slane %v4477_v49, 3 }
  0x5c   : > { %3440 = vmatmul.mubr.msk.bf16.gmra.mrb[4].mxu1 %vm358_vm1, %v579_v29  ;;  %v4432_v44 = vsel %vm706_vm5, %v2546_v46, %v2549_v39  ;;  %v4440_v29 = vld [vmem:[%s3990_s6 + $0x8] sm:$0xf] }
  0x5d   : > { %3443 = vmatprep.mubr.msk.bf16.mxu1 %vm358_vm1, %v581_v27  ;;  %v2689_v27 = vld [vmem:[%s3990_s6 + $0x10] sm:$0xc]  ;;  %v3160_v46 = vcombine.low %v1366_v55, %v4440_v29 }
  0x5e   : > { %v3260_v13 = vcombine.low %v2689_v27, %v4213_v4  ;;  %v911_v4 = vshrl.u32 %v4449_v2, 16  ;;  %v2701_v27 = vrot.slane %v4284_v8, 2 }
  0x5f   : > { %3556 = vmatmul.mubr.msk.bf16.gmra.mrb[16].mxu0 %vm358_vm1, %v3200_v56  ;;  %v2559_v56 = vrot.slane %v2269_v23, 1  ;;  %v3125_v23 = vcombine.low %v857_v45, %v4440_v29 }
  0x60   : > { %3561 = vmatprep.mubr.msk.bf16.mxu0 %vm358_vm1, %v2035_v48  ;;  %v2696_v25 = vrot.slane %v3260_v13, 2  ;;  %v2566_v48 = vrot.slane %v2564_v16, 1  ;;  %v1379_v13 = vrot.slane %v4488_v40, 3 }
  0x61   : > { %v2561_v26 = vor.u32 %v2560_v28, %v2559_v56  ;;  %v903_v39 = vshrl.u32 %v3125_v23, 16  ;;  %v4512_v56 = vcombine.low %v867_v21, %v1208_v7  ;;  %v1374_v28 = vrot.slane %v3160_v46, 3 }
  0x62   : > { %v906_v55 = vshll.u32 %v3125_v23, 16  ;;  %v2068_v23 = vshrl.u32 %v4195_v50, 16  ;;  %v913_v50 = vrot.slane %v911_v4, 1  ;;  %v923_v46 = vshll.u32 %v4477_v49, 16 }
  0x63   : > { %v4468_v0 = vsel %vm706_vm5, %v2557_v24, %v2561_v26 }
  0x64   : > { %3444 = vmatmul.mubr.msk.bf16.gmra.mrb[16].mxu1 %vm358_vm1, %v580_v42  ;;  %v4464_v42 = vsel %vm706_vm5, %v2553_v34, %v2557_v24  ;;  %v4491_v34 = vld [vmem:[%s3990_s6 + $0x24] sm:$0xff]   ;;  %v4518_v24 = vsel %vm1373_vm2, %v1375_v11, %v1377_v52 }
  0x65   : > { %3449 = vmatprep.mubr.msk.bf16.mxu1 %vm358_vm1, %v718_v3  ;;  %v1381_v16 = vrot.slane %v4491_v34, 3 }
  0x67   : > { %3562 = vmatmul.mubr.msk.bf16.vlgmr.msra.gmra.mrb[0].mxu0 %vm358_vm1, %v4205_v60  ;;  %v2699_v60 = vrot.slane %v4252_v38, 2  ;;  %v4503_v38 = vsel %vm377_vm0, %v2696_v25, %v2697_v33 }
  0x68   : > { %3565 = vmatprep.mubr.msk.bf16.mxu0 %vm358_vm1, %v4229_v22  ;;  %3574 = vmatpush3.bf16.msra.mxu0 %v2304_v54  ;;  %v2569_v22 = vrot.slane %v2567_v59, 2  ;;  %v2703_v54 = vrot.slane %v4287_v9, 2  ;;  %v1383_v59 = vrot.slane %v4512_v56, 3 }
  0x69   : > { %3762 = vmatprep.subr.msk.bf16.mxu0 %vm377_vm0, %v4461_v31  ;;  %v4506_v45 = vsel %vm377_vm0, %v2697_v33, %v2699_v60  ;;  %v4536_v9 = vsel %vm377_vm0, %v2699_v60, %v2701_v27  ;;  %v905_v33 = vrot.slane %v903_v39, 1  ;;  %v916_v60 = vrot.slane %v914_v18, 2 }
  0x6a   : > { %v4510_v3 = vor.u32 %v2569_v22, %v2566_v48  ;;  %v4553_v25 = vsel %vm1373_vm2, %v1381_v16, %v1383_v59  ;;  %v2705_v48 = vrot.slane %v4452_v5, 2  ;;  %v2070_v22 = vor.u32 %v2068_v23, %v4248_v37 }
  0x6b   : > { %v941_v23 = vshll.u32 %v4491_v34, 16  ;;  %v3912_v5 = vmov 0.0  }
  0x6c   : > { %3450 = vmatmul.mubr.msk.bf16.vlgmr.msra.gmra.mrb[0].mxu1 %vm358_vm1, %v4209_v62  ;;  %v4527_v8 = vsel %vm706_vm5, %v2561_v26, %v4510_v3  ;;  %v4530_v62 = vsel %vm1373_vm2, %v1374_v28, %v1375_v11  ;;  %v4545_v26 = vsel %vm1373_vm2, %v1379_v13, %v1381_v16  ;;  %v4561_v7 = vsel %vm377_vm0, %v2703_v54, %v2705_v48 }
  0x6d   : > { %3462 = vmatpush3.bf16.msra.mxu1 %v979_v53  ;;  %3453 = vmatprep.mubr.msk.bf16.mxu1 %vm358_vm1, %v4246_v61  ;;  %v4539_v53 = vsel %vm377_vm0, %v2701_v27, %v2703_v54  ;;  %v4542_v61 = vsel %vm1373_vm2, %v1377_v52, %v1379_v13  ;;  %v917_v11 = vor.u32 %v916_v60, %v913_v50  ;;  %v929_v52 = vshrl.u32 %v4488_v40, 16  ;;  %v868_v27 = vld [vmem:[%s3990_s6 + $0x30] sm:$0x3] }
  0x6e   : > { %3754 = vmatprep.subr.msk.bf16.mxu1 %vm377_vm0, %v4499_v35  ;;  %v932_v28 = vshll.u32 %v4488_v40, 16  ;;  %v4589_v16 = vcombine.low %v867_v21, %v868_v27  ;;  %249 = vst.msk [vmem:[#allocation2 + $0x10] sm:$0xff] %vm246_vm8, %v3912_v5  ;;  %247 = vst.msk [vmem:[#allocation2] sm:$0xff] %vm246_vm8, %v3912_v5 }
  0x6f   : > { %3566 = vmatmul.mubr.msk.bf16.gmra.mrb[4].mxu0 %vm358_vm1, %v4241_v12  ;;  %v908_v12 = vrot.slane %v906_v55, 2  ;;  %v931_v54 = vrot.slane %v929_v52, 1  ;;  %v938_v55 = vshrl.u32 %v4491_v34, 16  ;;  %248 = vst.msk [vmem:[#allocation2 + $0x8] sm:$0xff] %vm246_vm8, %v3912_v5  ;;  %250 = vst.msk [vmem:[#allocation2 + $0x18] sm:$0xff] %vm246_vm8, %v3912_v5 }
  0x70   : > { %3569 = vmatprep.mubr.msk.bf16.mxu0 %vm358_vm1, %v4263_v47  ;;  %v920_v47 = vshrl.u32 %v4477_v49, 16  ;;  %v934_v13 = vrot.slane %v932_v28, 2  ;;  %v947_v21 = vshrl.u32 %v4589_v16, 16  ;;  %v950_v60 = vshll.u32 %v4589_v16, 16  ;;  %251 = vst.msk [vmem:[#allocation2 + $0x20] sm:$0xff] %vm246_vm8, %v3912_v5  ;;  %252 = vst.msk [vmem:[#allocation2 + $0x28] sm:$0xff] %vm246_vm8, %v3912_v5 }
  0x71   : > { %v909_v39 = vor.u32 %v908_v12, %v905_v33  ;;  %v2439_v33 = vsel %vm377_vm0, %v4461_v31, 0  ;;  %v3865_v12 = vld [vmem:[%s4911_s1 + $0x70] sm:$0x3f]   ;;  %v940_v31 = vrot.slane %v938_v55, 1  ;;  %253 = vst.msk [vmem:[#allocation2 + $0x30] sm:$0xff] %vm246_vm8, %v3912_v5  ;;  %254 = vst.msk [vmem:[#allocation2 + $0x38] sm:$0xff] %vm246_vm8, %v3912_v5 }
  0x72   : > { %v922_v37 = vrot.slane %v920_v47, 1  ;;  %v935_v50 = vor.u32 %v934_v13, %v931_v54  ;;  %v949_v27 = vrot.slane %v947_v21, 1  ;;  %255 = vst.msk [vmem:[#allocation2 + $0x40] sm:$0xff] %vm246_vm8, %v3912_v5  ;;  %256 = vst.msk [vmem:[#allocation2 + $0x48] sm:$0xff] %vm246_vm8, %v3912_v5 }
  0x73   : > { %257 = vst.msk [vmem:[#allocation2 + $0x50] sm:$0xff] %vm246_vm8, %v3912_v5 }
  0x74   : > { %3454 = vmatmul.mubr.msk.bf16.gmra.mrb[4].mxu1 %vm358_vm1, %v4255_v14  ;;  %v925_v14 = vrot.slane %v923_v46, 2 }
  0x75   : > { %3457 = vmatprep.mubr.msk.bf16.mxu1 %vm358_vm1, %v4293_v43  ;;  %v918_v43 = vsel %vm706_vm5, %v909_v39, %v917_v11  ;;  %v1115_v39 = vsel %vm377_vm0, %v4499_v35, 0  ;;  %v2277_v35 = vshrl.u32 %v4341_v57, 16  ;;  %v1233_v57 = vrot.slane %v932_v28, 3 }
  0x77   : > { %3570 = vmatmul.mubr.msk.bf16.gmra.mrb[20].mxu0 %vm358_vm1, %v2070_v22  ;;  %v943_v22 = vrot.slane %v941_v23, 2 }
  0x78   : > { %3575 = vmatprep.mubr.msk.bf16.mxu0 %vm358_vm1, %v4299_v6  ;;  %v926_v6 = vor.u32 %v925_v14, %v922_v37  ;;  %v952_v37 = vrot.slane %v950_v60, 2  ;;  %v1085_v60 = vrot.slane %v4488_v40, 2 }
  0x7a   : > { %v953_v14 = vor.u32 %v952_v37, %v949_v27 }
  0x7c   : > { %3458 = vmatmul.mubr.msk.bf16.gmra.mrb[20].mxu1 %vm358_vm1, %v4275_v1  ;;  %v927_v1 = vsel %vm706_vm5, %v917_v11, %v926_v6  ;;  %v944_v11 = vor.u32 %v943_v22, %v940_v31  ;;  %v3866_v31 = vld [vmem:[%s4911_s1 + $0x38] sm:$0x3f]  }
  0x7d   : > { %3463 = vmatprep.mubr.msk.bf16.mxu1 %vm358_vm1, %v918_v43  ;;  %v1072_v43 = vld [vmem:[%s3990_s6 + $0x4] sm:$0xc]  ;;  %v1409_v28 = vsel %vm377_vm0, %v3866_v31, 0 }
  0x7e   : > { %v945_v54 = vsel %vm706_vm5, %v935_v50, %v944_v11  ;;  %v954_v13 = vsel %vm706_vm5, %v944_v11, %v953_v14  ;;  %v1224_v11 = vrot.slane %v911_v4, 2 }
  0x7f   : > { %3576 = vmatmul.mubr.msk.bf16.vlgmr.msra.gmra.mrb[0].mxu0 %vm358_vm1, %v4302_v51  ;;  %v936_v51 = vsel %vm706_vm5, %v926_v6, %v935_v50  ;;  %v3140_v6 = vcombine.low %v1072_v43, %v4440_v29  ;;  %v2596_v29 = vsel %vm377_vm0, %v3865_v12, 0  ;;  %v3869_v50 = vld [vmem:[%s4911_s1 + $0x78] sm:$0x3f]  }
  0x80   : > { %3579 = vmatprep.mubr.msk.bf16.mxu0 %vm358_vm1, %v4336_v30  ;;  %3588 = vmatpush3.bf16.msra.mxu0 %v2439_v33  ;;  %v3864_v30 = vld [vmem:[%s4911_s1 + $0x30] sm:$0x3f]   ;;  %v2279_v33 = vor.u32 %v2277_v35, %v4364_v20  ;;  %v1083_v20 = vrot.slane %v4477_v49, 2  ;;  %v1244_v49 = vshll.u32 %v4512_v56, 16 }
  0x81   : > { %3763 = vmatprep.subr.msk.bf16.mxu0 %vm377_vm0, %v3865_v12  ;;  %v1080_v21 = vrot.slane %v3140_v6, 2  ;;  %v1217_v22 = vshrl.u32 %v3140_v6, 16 }
  0x82   : > { %v1086_v12 = vsel %vm377_vm0, %v1083_v20, %v1085_v60 }
  0x83   : > { %v1219_v37 = vrot.slane %v1217_v22, 2 }
  0x84   : > { %3464 = vmatmul.mubr.msk.bf16.vlgmr.msra.gmra.mrb[0].mxu1 %vm358_vm1, %v927_v1  ;;  %v1273_v1 = vsel %vm377_vm0, %v3864_v30, 0 }
  0x85   : > { %3476 = vmatpush3.bf16.msra.mxu1 %v1115_v39  ;;  %3467 = vmatprep.mubr.msk.bf16.mxu1 %vm358_vm1, %v936_v51  ;;  %v1220_v39 = vshll.u32 %v3140_v6, 16 }
  0x86   : > { %3755 = vmatprep.subr.msk.bf16.mxu1 %vm377_vm0, %v3864_v30 }
  0x87   : > { %3580 = vmatmul.mubr.msk.bf16.gmra.mrb[4].mxu0 %vm358_vm1, %v4348_v15  ;;  %v1081_v15 = vrot.slane %v4449_v2, 2  ;;  %v1222_v30 = vrot.slane %v1220_v39, 3  ;;  %v1229_v2 = vrot.slane %v923_v46, 3  ;;  %v1236_v46 = vrot.slane %v938_v55, 2 }
  0x88   : > { %3583 = vmatprep.mubr.msk.bf16.mxu0 %vm358_vm1, %v4377_v36 }
  0x89   : > { %v1082_v36 = vsel %vm377_vm0, %v1080_v21, %v1081_v15 }
  0x8c   : > { %3468 = vmatmul.mubr.msk.bf16.gmra.mrb[4].mxu1 %vm358_vm1, %v945_v54 }
  0x8d   : > { %3471 = vmatprep.mubr.msk.bf16.mxu1 %vm358_vm1, %v954_v13  ;;  %v1246_v13 = vrot.slane %v1244_v49, 3 }
  0x8f   : > { %3584 = vmatmul.mubr.msk.bf16.gmra.mrb[24].mxu0 %vm358_vm1, %v2279_v33 }
  0x90   : > { %3589 = vmatprep.mubr.msk.bf16.mxu0 %vm358_vm1, %v4389_v41  ;;  %v1084_v41 = vsel %vm377_vm0, %v1081_v15, %v1083_v20 }
  0x94   : > { %3472 = vmatmul.mubr.msk.bf16.gmra.mrb[24].mxu1 %vm358_vm1, %v953_v14 }
  0x95   : > { %3477 = vmatprep.mubr.msk.bf16.mxu1 %vm358_vm1, %v1082_v36 }
  0x97   : > { %3590 = vmatmul.mubr.msk.bf16.vlgmr.msra.gmra.mrb[0].mxu0 %vm358_vm1, %v4382_v10  ;;  %v1087_v10 = vrot.slane %v4491_v34, 2 }
  0x98   : > { %3593 = vmatprep.mubr.msk.bf16.mxu0 %vm358_vm1, %v4401_v17  ;;  %3602 = vmatpush3.bf16.msra.mxu0 %v2596_v29  ;;  %v1089_v17 = vrot.slane %v4589_v16, 2  ;;  %v1225_v16 = vrot.slane %v914_v18, 3  ;;  %v1232_v18 = vrot.slane %v929_v52, 2  ;;  %v1237_v52 = vrot.slane %v941_v23, 3 }
  0x99   : > { %3764 = vmatprep.subr.msk.bf16.mxu0 %vm377_vm0, %v3869_v50  ;;  %v1088_v51 = vsel %vm377_vm0, %v1085_v60, %v1087_v10 }
  0x9a   : > { %v1090_v27 = vsel %vm377_vm0, %v1087_v10, %v1089_v17  ;;  %v1226_v14 = vor.u32 %v1225_v16, %v1224_v11  ;;  %v1234_v35 = vor.u32 %v1233_v57, %v1232_v18 }
  0x9c   : > { %3478 = vmatmul.mubr.msk.bf16.vlgmr.msra.gmra.mrb[0].mxu1 %vm358_vm1, %v1084_v41 }
  0x9d   : > { %3490 = vmatpush3.bf16.msra.mxu1 %v1273_v1  ;;  %3481 = vmatprep.mubr.msk.bf16.mxu1 %vm358_vm1, %v1086_v12 }
  0x9e   : > { %3756 = vmatprep.subr.msk.bf16.mxu1 %vm377_vm0, %v3866_v31 }
  0x9f   : > { %3594 = vmatmul.mubr.msk.bf16.gmra.mrb[4].mxu0 %vm358_vm1, %v4404_v58  ;;  %v1223_v58 = vor.u32 %v1222_v30, %v1219_v37 }
  0xa0   : > { %3597 = vmatprep.mubr.msk.bf16.mxu0 %vm358_vm1, %v4411_v32  ;;  %v1228_v32 = vrot.slane %v920_v47, 2  ;;  %v1241_v47 = vshrl.u32 %v4512_v56, 16 }
  0xa1   : > { %v1227_v4 = vsel %vm1215_vm7, %v1223_v58, %v1226_v14 }
  0xa2   : > { %v1243_v54 = vrot.slane %v1241_v47, 2 }
  0xa4   : > { %3482 = vmatmul.mubr.msk.bf16.gmra.mrb[4].mxu1 %vm358_vm1, %v1088_v51 }
  0xa5   : > { %3485 = vmatprep.mubr.msk.bf16.mxu1 %vm358_vm1, %v1090_v27 }
  0xa7   : > { %3598 = vmatmul.mubr.msk.bf16.gmra.mrb[28].mxu0 %vm358_vm1, %v2413_v19  ;;  %v1230_v19 = vor.u32 %v1229_v2, %v1228_v32 }
  0xa8   : > { %3603 = vmatprep.mubr.msk.bf16.mxu0 %vm358_vm1, %v4432_v44  ;;  %v2731_v44 = vsel %vm377_vm0, %v3869_v50, 0 }
  0xa9   : > { %v1231_v40 = vsel %vm1215_vm7, %v1226_v14, %v1230_v19  ;;  %v1235_v43 = vsel %vm1215_vm7, %v1230_v19, %v1234_v35 }
  0xac   : > { %3486 = vmatmul.mubr.msk.bf16.gmra.mrb[28].mxu1 %vm358_vm1, %v1089_v17 }
  0xad   : > { %3491 = vmatprep.mubr.msk.bf16.mxu1 %vm358_vm1, %v1227_v4 }
  0xaf   : > { %3604 = vmatmul.mubr.msk.bf16.vlgmr.msra.gmra.mrb[0].mxu0 %vm358_vm1, %v4426_v63  ;;  %v1238_v63 = vor.u32 %v1237_v52, %v1236_v46 }
  0xb0   : > { %3607 = vmatprep.mubr.msk.bf16.mxu0 %vm358_vm1, %v4464_v42  ;;  %3616 = vmatpush3.bf16.msra.mxu0 %v2731_v44  ;;  %v1247_v42 = vor.u32 %v1246_v13, %v1243_v54 }
  0xb1   : > { %v1239_v34 = vsel %vm1215_vm7, %v1234_v35, %v1238_v63 }
  0xb2   : > { %v1248_v55 = vsel %vm1215_vm7, %v1238_v63, %v1247_v42 }
  0xb4   : > { %3492 = vmatmul.mubr.msk.bf16.vlgmr.msra.gmra.mrb[0].mxu1 %vm358_vm1, %v1231_v40 }
  0xb5   : > { %3504 = vmatpush3.bf16.msra.mxu1 %v1409_v28  ;;  %3495 = vmatprep.mubr.msk.bf16.mxu1 %vm358_vm1, %v1235_v43 }
  0xb7   : > { %3608 = vmatmul.mubr.msk.bf16.gmra.mrb[4].mxu0 %vm358_vm1, %v4468_v0 }
  0xb8   : > { %3611 = vmatprep.mubr.msk.bf16.mxu0 %vm358_vm1, %v4527_v8 }
  0xbc   : > { %3496 = vmatmul.mubr.msk.bf16.gmra.mrb[4].mxu1 %vm358_vm1, %v1239_v34 }
  0xbd   : > { %3499 = vmatprep.mubr.msk.bf16.mxu1 %vm358_vm1, %v1248_v55 }
  0xbf   : > { %3612 = vmatmul.mubr.msk.bf16.gmra.mrb[32].mxu0 %vm358_vm1, %v4510_v3 }
  0xc0   : > { %3617 = vmatprep.mubr.msk.bf16.mxu0 %vm358_vm1, %v4503_v38 }
  0xc4   : > { %3500 = vmatmul.mubr.msk.bf16.gmra.mrb[32].mxu1 %vm358_vm1, %v1247_v42 }
  0xc5   : > { %3505 = vmatprep.mubr.msk.bf16.mxu1 %vm358_vm1, %v4530_v62 }
  0xc7   : > { %3618 = vmatmul.mubr.msk.bf16.vlgmr.msra.gmra.mrb[0].mxu0 %vm358_vm1, %v4506_v45 }
  0xc8   : > { %3621 = vmatprep.mubr.msk.bf16.mxu0 %vm358_vm1, %v4536_v9 }
  0xcc   : > { %3506 = vmatmul.mubr.msk.bf16.vlgmr.msra.gmra.mrb[0].mxu1 %vm358_vm1, %v4518_v24 }
  0xcd   : > { %3509 = vmatprep.mubr.msk.bf16.mxu1 %vm358_vm1, %v4542_v61 }
  0xcf   : > { %3622 = vmatmul.mubr.msk.bf16.gmra.mrb[4].mxu0 %vm358_vm1, %v4539_v53 }
  0xd0   : > { %3625 = vmatprep.mubr.msk.bf16.mxu0 %vm358_vm1, %v4561_v7 }
  0xd4   : > { %3510 = vmatmul.mubr.msk.bf16.gmra.mrb[4].mxu1 %vm358_vm1, %v4545_v26 }
  0xd5   : > { %3513 = vmatprep.mubr.msk.bf16.mxu1 %vm358_vm1, %v4553_v25 }
  0xd7   : > { %3626 = vmatmul.mubr.msk.bf16.gmra.mrb[36].mxu0 %vm358_vm1, %v2705_v48 }
  0xdc   : > { %3514 = vmatmul.mubr.msk.bf16.gmra.mrb[36].mxu1 %vm358_vm1, %v1383_v59 }
 0x102   : > { %v4744_v0 = vpop.f32.mrb[8].mxu0 }
 0x103   : > { %v4746_v38 = vpop.f32.mrb[9].mxu0 }
 0x104   : > { %v3530_v45 = vpop.f32.mrb[10].mxu0 }
 0x105   : > { %v4748_v3 = vpop.f32.mrb[11].mxu0 }
 0x107   : > { %v3417_v24 = vpop.f32.mrb[8].mxu1 }
 0x108   : > { %v447_v8 = vpop.f32.mrb[9].mxu1 }
 0x109   : > { %v3418_v62 = vpop.f32.mrb[10].mxu1 }
 0x10a   : > { %v450_v9 = vpop.f32.mrb[11].mxu1 }
 0x11a   : > { %v4750_v53 = vpop.f32.mrb[12].mxu0 }
 0x11b   : > { %v4763_v56 = vpop.f32.mrb[13].mxu0 }
 0x11c   : > { %v3544_v59 = vpop.f32.mrb[14].mxu0 }
 0x11d   : > { %v4765_v61 = vpop.f32.mrb[15].mxu0 }
 0x11f   : > { %v3431_v26 = vpop.f32.mrb[12].mxu1 }
 0x120   : > { %v558_v25 = vadd.f32 %v3431_v26, %v3417_v24  ;;  %v549_v48 = vpop.f32.mrb[13].mxu1 }
 0x121   : > { %v550_v7 = vadd.f32 %v549_v48, %v447_v8  ;;  %v3432_v23 = vpop.f32.mrb[14].mxu1 }
 0x122   : > { %v552_v6 = vpop.f32.mrb[15].mxu1 }
 0x123   : > { %v553_v33 = vadd.f32 %v552_v6, %v450_v9 }
 0x132   : > { %v4767_v21 = vpop.f32.mrb[16].mxu0 }
 0x133   : > { %v4769_v15 = vpop.f32.mrb[17].mxu0 }
 0x134   : > { %v3558_v36 = vpop.f32.mrb[18].mxu0 }
 0x135   : > { %v4771_v20 = vpop.f32.mrb[19].mxu0 }
 0x137   : > { %v3445_v29 = vpop.f32.mrb[16].mxu1 }
 0x138   : > { %v698_v50 = vadd.f32 %v3445_v29, %v558_v25  ;;  %v674_v60 = vpop.f32.mrb[17].mxu1 }
 0x139   : > { %v696_v41 = vadd.f32 %v674_v60, %v550_v7  ;;  %v3446_v1 = vpop.f32.mrb[18].mxu1 }
 0x13a   : > { %v677_v12 = vpop.f32.mrb[19].mxu1  ;;  %v2824_v1 = vld [vmem:[#allocation2] sm:$0xff] }
 0x13b   : > { %v697_v31 = vadd.f32 %v677_v12, %v553_v33 }
 0x14a   : > { %v4773_v10 = vpop.f32.mrb[20].mxu0 }
 0x14b   : > { %v4775_v17 = vpop.f32.mrb[21].mxu0 }
 0x14c   : > { %v3572_v22 = vpop.f32.mrb[22].mxu0 }
 0x14d   : > { %v4777_v39 = vpop.f32.mrb[23].mxu0  ;;  %v2827_v22 = vld [vmem:[#allocation2 + $0x18] sm:$0xff] }
 0x14f   : > { %v3459_v51 = vpop.f32.mrb[20].mxu1 }
 0x150   : > { %v856_v27 = vadd.f32 %v3459_v51, %v698_v50  ;;  %v832_v37 = vpop.f32.mrb[21].mxu1  ;;  %v2826_v50 = vld [vmem:[#allocation2 + $0x10] sm:$0xff] }
 0x151   : > { %v854_v30 = vadd.f32 %v832_v37, %v696_v41  ;;  %v3460_v11 = vpop.f32.mrb[22].mxu1 }
 0x152   : > { %v835_v16 = vpop.f32.mrb[23].mxu1 }
 0x153   : > { %v855_v58 = vadd.f32 %v835_v16, %v697_v31 }
 0x162   : > { %v4779_v14 = vpop.f32.mrb[24].mxu0 }
 0x163   : > { %v4781_v32 = vpop.f32.mrb[25].mxu0 }
 0x164   : > { %v3586_v2 = vpop.f32.mrb[26].mxu0 }
 0x165   : > { %v4783_v4 = vpop.f32.mrb[27].mxu0 }
 0x167   : > { %v3473_v18 = vpop.f32.mrb[24].mxu1 }
 0x168   : > { %v1071_v57 = vadd.f32 %v3473_v18, %v856_v27  ;;  %v1047_v19 = vpop.f32.mrb[25].mxu1 }
 0x169   : > { %v1069_v44 = vadd.f32 %v1047_v19, %v854_v30  ;;  %v3474_v35 = vpop.f32.mrb[26].mxu1  ;;  %v2825_v30 = vld [vmem:[#allocation2 + $0x8] sm:$0xff] }
 0x16a   : > { %v1050_v47 = vpop.f32.mrb[27].mxu1 }
 0x16b   : > { %v1070_v49 = vadd.f32 %v1050_v47, %v855_v58  ;;  %v2830_v47 = vld [vmem:[#allocation2 + $0x30] sm:$0xff] }
 0x17a   : > { %v4785_v40 = vpop.f32.mrb[28].mxu0 }
 0x17b   : > { %v4787_v46 = vpop.f32.mrb[29].mxu0 }
 0x17c   : > { %v3600_v52 = vpop.f32.mrb[30].mxu0 }
 0x17d   : > { %v4789_v28 = vpop.f32.mrb[31].mxu0 }
 0x17f   : > { %v3487_v43 = vpop.f32.mrb[28].mxu1 }
 0x180   : > { %v1207_v54 = vadd.f32 %v3487_v43, %v1071_v57  ;;  %v1183_v13 = vpop.f32.mrb[29].mxu1  ;;  %v2828_v43 = vld [vmem:[#allocation2 + $0x20] sm:$0xff] }
 0x181   : > { %v1205_v63 = vadd.f32 %v1183_v13, %v1069_v44  ;;  %v3488_v42 = vpop.f32.mrb[30].mxu1 }
 0x182   : > { %v1186_v34 = vpop.f32.mrb[31].mxu1  ;;  %v2831_v42 = vld [vmem:[#allocation2 + $0x38] sm:$0xff] }
 0x183   : > { %v1206_v55 = vadd.f32 %v1186_v34, %v1070_v49 }
 0x192   : > { %v4791_v45 = vpop.f32.mrb[32].mxu0 }
 0x193   : > { %v4793_v24 = vpop.f32.mrb[33].mxu0 }
 0x194   : > { %v3614_v8 = vpop.f32.mrb[34].mxu0 }
 0x195   : > { %v4795_v62 = vpop.f32.mrb[35].mxu0 }
 0x197   : > { %v3501_v9 = vpop.f32.mrb[32].mxu1 }
 0x198   : > { %v4797_v5 = vadd.f32 %v3501_v9, %v1207_v54  ;;  %v1341_v59 = vpop.f32.mrb[33].mxu1  ;;  %v4814_v54 = vld [vmem:[%s4912_s2] ss:$0 sm:$0xff]  ;;  %v2829_v9 = vld [vmem:[#allocation2 + $0x28] sm:$0xff] }
 0x199   : > { %v4799_v26 = vadd.f32 %v1341_v59, %v1205_v63  ;;  %v3502_v25 = vpop.f32.mrb[34].mxu1 }
 0x19a   : > { %v1344_v48 = vpop.f32.mrb[35].mxu1  ;;  %v3619_v7 = vpop.f32.mrb[0].mxu0 }
 0x19b   : > { %v4801_v23 = vadd.f32 %v1344_v48, %v1206_v55  ;;  %v2767_v6 = vpop.f32.mrb[1].mxu0 }
 0x19c   : > { %v3620_v33 = vpop.f32.mrb[2].mxu0 }
 0x19d   : > { %v2770_v36 = vpop.f32.mrb[3].mxu0 }
 0x19f   : > { %v3507_v29 = vpop.f32.mrb[0].mxu1 }
 0x1a0   : > { %v3629_v60 = vadd.f32 %v3619_v7, %v3507_v29  ;;  %v1445_v41 = vpop.f32.mrb[1].mxu1 }
 0x1a1   : > { %v3630_v12 = vadd.f32 %v2767_v6, %v1445_v41  ;;  %v3508_v31 = vpop.f32.mrb[2].mxu1 }
 0x1a2   : > { %v2837_v51 = vadd.f32 %v3629_v60, %v2826_v50  ;;  %v3631_v27 = vadd.f32 %v3620_v33, %v3508_v31  ;;  %v1448_v37 = vpop.f32.mrb[3].mxu1  ;;  %v3623_v11 = vpop.f32.mrb[4].mxu0 }
 0x1a3   : > { %v2835_v16 = vadd.f32 %v3630_v12, %v2824_v1  ;;  %v3632_v58 = vadd.f32 %v2770_v36, %v1448_v37  ;;  %v2783_v2 = vpop.f32.mrb[5].mxu0 }
 0x1a4   : > { %2849 = vst.msk [vmem:[#allocation2 + $0x10] sm:$0xff] %vm246_vm8, %v2837_v51  ;;  %v2838_v18 = vadd.f32 %v3631_v27, %v2827_v22  ;;  %v3624_v57 = vpop.f32.mrb[6].mxu0 }
 0x1a5   : > { %2847 = vst.msk [vmem:[#allocation2] sm:$0xff] %vm246_vm8, %v2835_v16  ;;  %v2836_v19 = vadd.f32 %v3632_v58, %v2825_v30  ;;  %v2786_v44 = vpop.f32.mrb[7].mxu0 }
 0x1a6   : > { %2850 = vst.msk [vmem:[#allocation2 + $0x18] sm:$0xff] %vm246_vm8, %v2838_v18 }
 0x1a7   : > { %2848 = vst.msk [vmem:[#allocation2 + $0x8] sm:$0xff] %vm246_vm8, %v2836_v19  ;;  %v3511_v35 = vpop.f32.mrb[4].mxu1 }
 0x1a8   : > { %v3633_v49 = vadd.f32 %v3623_v11, %v3511_v35  ;;  %v1461_v52 = vpop.f32.mrb[5].mxu1 }
 0x1a9   : > { %v3634_v13 = vadd.f32 %v2783_v2, %v1461_v52  ;;  %v3512_v63 = vpop.f32.mrb[6].mxu1 }
 0x1aa   : > { %v2841_v34 = vadd.f32 %v3633_v49, %v2830_v47  ;;  %v3635_v55 = vadd.f32 %v3624_v57, %v3512_v63  ;;  %v1464_v8 = vpop.f32.mrb[7].mxu1  ;;  %v4816_v59 = vpop.f32.mrb[36].mxu0 }
 0x1ab   : > { %v2863_v25 = vld [vmem:[#allocation2 + $0x10] sm:$0xff]  ;;  %v2839_v48 = vadd.f32 %v3634_v13, %v2828_v43  ;;  %v3636_v7 = vadd.f32 %v2786_v44, %v1464_v8  ;;  %v4818_v6 = vpop.f32.mrb[37].mxu0 }
 0x1ac   : > { %v2881_v33 = vadd.f32 %v4814_v54, %v2863_v25  ;;  %v2861_v36 = vld [vmem:[#allocation2] sm:$0xff]  ;;  %2853 = vst.msk [vmem:[#allocation2 + $0x30] sm:$0xff] %vm246_vm8, %v2841_v34  ;;  %v2842_v29 = vadd.f32 %v3635_v55, %v2831_v42  ;;  %v3628_v50 = vpop.f32.mrb[38].mxu0 }
 0x1ad   : > { %v2879_v60 = vadd.f32 %v4814_v54, %v2861_v36  ;;  %v2864_v41 = vld [vmem:[#allocation2 + $0x18] sm:$0xff]  ;;  %2851 = vst.msk [vmem:[#allocation2 + $0x20] sm:$0xff] %vm246_vm8, %v2839_v48  ;;  %v2840_v1 = vadd.f32 %v3636_v7, %v2829_v9  ;;  %v4825_v12 = vpop.f32.mrb[39].mxu0 }
 0x1ae   : > { %v2892_v31 = vmax.f32 %v2881_v33, 0.0  ;;  %v2882_v22 = vadd.f32 %v4814_v54, %v2864_v41  ;;  %v2862_v51 = vld [vmem:[#allocation2 + $0x8] sm:$0xff]  ;;  %2854 = vst.msk [vmem:[#allocation2 + $0x38] sm:$0xff] %vm246_vm8, %v2842_v29 }
 0x1af   : > { %v2890_v27 = vmax.f32 %v2879_v60, 0.0  ;;  %v2880_v37 = vadd.f32 %v4814_v54, %v2862_v51  ;;  %2852 = vst.msk [vmem:[#allocation2 + $0x28] sm:$0xff] %vm246_vm8, %v2840_v1  ;;  %v3515_v30 = vpop.f32.mrb[36].mxu1 }
 0x1b0   : > { %v3284_v11 = vpack.c.bf16 %v2892_v31, %v2892_v31  ;;  %v2893_v16 = vmax.f32 %v2882_v22, 0.0  ;;  %v1501_v58 = vadd.f32 %v3515_v30, %v4797_v5  ;;  %v1477_v2 = vpop.f32.mrb[37].mxu1 }
 0x1b1   : > { %v3282_v18 = vpack.c.bf16 %v2890_v27, %v2890_v27  ;;  %v2891_v57 = vmax.f32 %v2880_v37, 0.0  ;;  %v1499_v19 = vadd.f32 %v1477_v2, %v4799_v26  ;;  %v3516_v44 = vpop.f32.mrb[38].mxu1 }
 0x1b2   : > { %2949 = vst.msk [vmem:[%s4832_s24 + $0x8] sm:$0xf] %vm2946_vm9, %v3284_v11  ;;  %v3285_v35 = vpack.c.bf16 %v2893_v16, %v2893_v16  ;;  %v1674_v47 = vadd.f32 %v4744_v0, %v1501_v58  ;;  %v1480_v49 = vpop.f32.mrb[39].mxu1  ;;  %v2833_v11 = vld [vmem:[#allocation2 + $0x48] sm:$0xff] }
 0x1b3   : > { %2947 = vst.msk [vmem:[%s4832_s24] sm:$0xf] %vm2946_vm9, %v3282_v18  ;;  %v3283_v52 = vpack.c.bf16 %v2891_v57, %v2891_v57  ;;  %v2867_v43 = vld [vmem:[#allocation2 + $0x30] sm:$0xff]  ;;  %v1672_v13 = vadd.f32 %v4746_v38, %v1499_v19  ;;  %v1500_v5 = vadd.f32 %v1480_v49, %v4801_v23 }
 0x1b4   : > { %2950 = vst.msk [vmem:[%s4832_s24 + $0xc] sm:$0xf] %vm2946_vm9, %v3285_v35  ;;  %v2885_v63 = vadd.f32 %v4814_v54, %v2867_v43  ;;  %v2865_v26 = vld [vmem:[#allocation2 + $0x20] sm:$0xff]  ;;  %v1852_v42 = vadd.f32 %v4750_v53, %v1674_v47 }
 0x1b5   : > { %2948 = vst.msk [vmem:[%s4832_s24 + $0x4] sm:$0xf] %vm2946_vm9, %v3283_v52  ;;  %v2883_v0 = vadd.f32 %v4814_v54, %v2865_v26  ;;  %v2868_v34 = vld [vmem:[#allocation2 + $0x38] sm:$0xff]  ;;  %v1850_v55 = vadd.f32 %v4763_v56, %v1672_v13  ;;  %v1673_v8 = vadd.f32 %v4748_v3, %v1500_v5 }
 0x1b6   : > { %v2896_v38 = vmax.f32 %v2885_v63, 0.0  ;;  %v2886_v23 = vadd.f32 %v4814_v54, %v2868_v34  ;;  %v2866_v9 = vld [vmem:[#allocation2 + $0x28] sm:$0xff]  ;;  %v1978_v25 = vadd.f32 %v4767_v21, %v1852_v42 }
 0x1b7   : > { %v2894_v48 = vmax.f32 %v2883_v0, 0.0  ;;  %v2884_v53 = vadd.f32 %v4814_v54, %v2866_v9  ;;  %v1976_v7 = vadd.f32 %v4769_v15, %v1850_v55  ;;  %v1851_v33 = vadd.f32 %v4765_v61, %v1673_v8 }
 0x1b8   : > { %v3288_v36 = vpack.c.bf16 %v2896_v38, %v2896_v38  ;;  %v2897_v56 = vmax.f32 %v2886_v23, 0.0  ;;  %v2187_v3 = vadd.f32 %v4773_v10, %v1978_v25 }
 0x1b9   : > { %v3286_v29 = vpack.c.bf16 %v2894_v48, %v2894_v48  ;;  %v2895_v50 = vmax.f32 %v2884_v53, 0.0  ;;  %v1977_v60 = vadd.f32 %v4771_v20, %v1851_v33  ;;  %v2185_v41 = vadd.f32 %v4775_v17, %v1976_v7 }
 0x1ba   : > { %2953 = vst.msk [vmem:[%s4832_s24 + $0x18] sm:$0xf] %vm2946_vm9, %v3288_v36  ;;  %v3289_v21 = vpack.c.bf16 %v2897_v56, %v2897_v56  ;;  %v2396_v1 = vadd.f32 %v4779_v14, %v2187_v3  ;;  %v2834_v14 = vld [vmem:[#allocation2 + $0x50] sm:$0xff] }
 0x1bb   : > { %2951 = vst.msk [vmem:[%s4832_s24 + $0x10] sm:$0xf] %vm2946_vm9, %v3286_v29  ;;  %v3287_v15 = vpack.c.bf16 %v2895_v50, %v2895_v50  ;;  %v2394_v61 = vadd.f32 %v4781_v32, %v2185_v41  ;;  %v2186_v31 = vadd.f32 %v4777_v39, %v1977_v60  ;;  %v2832_v39 = vld [vmem:[#allocation2 + $0x40] sm:$0xff] }
 0x1bc   : > { %2954 = vst.msk [vmem:[%s4832_s24 + $0x1c] sm:$0xf] %vm2946_vm9, %v3289_v21  ;;  %v2531_v10 = vadd.f32 %v4785_v40, %v2396_v1 }
 0x1bd   : > { %2952 = vst.msk [vmem:[%s4832_s24 + $0x14] sm:$0xf] %vm2946_vm9, %v3287_v15  ;;  %v2529_v20 = vadd.f32 %v4787_v46, %v2394_v61  ;;  %v2395_v17 = vadd.f32 %v4783_v4, %v2186_v31 }
 0x1be   : > { %v2688_v22 = vadd.f32 %v4791_v45, %v2531_v10 }
 0x1bf   : > { %v2686_v51 = vadd.f32 %v4793_v24, %v2529_v20  ;;  %v2530_v27 = vadd.f32 %v4789_v28, %v2395_v17 }
 0x1c0   : > { %v2823_v32 = vadd.f32 %v4816_v59, %v2688_v22 }
 0x1c1   : > { %v2821_v37 = vadd.f32 %v4818_v6, %v2686_v51  ;;  %v2687_v40 = vadd.f32 %v4795_v62, %v2530_v27 }
 0x1c2   : > { %v2845_v30 = vadd.f32 %v2834_v14, %v2823_v32 }
 0x1c3   : > { %v2843_v16 = vadd.f32 %v2832_v39, %v2821_v37  ;;  %v2822_v46 = vadd.f32 %v4825_v12, %v2687_v40 }
 0x1c4   : > { %2857 = vst.msk [vmem:[#allocation2 + $0x50] sm:$0xff] %vm246_vm8, %v2845_v30 }
 0x1c5   : > { %2855 = vst.msk [vmem:[#allocation2 + $0x40] sm:$0xff] %vm246_vm8, %v2843_v16  ;;  %v2844_v4 = vadd.f32 %v2833_v11, %v2822_v46 }
 0x1c7   : > { %2856 = vst.msk [vmem:[#allocation2 + $0x48] sm:$0xff] %vm246_vm8, %v2844_v4 }
 0x1cb   : > { %v2871_v28 = vld [vmem:[#allocation2 + $0x50] sm:$0xff] }
 0x1cc   : > { %v2889_v45 = vadd.f32 %v4814_v54, %v2871_v28  ;;  %v2869_v24 = vld [vmem:[#allocation2 + $0x40] sm:$0xff] }
 0x1cd   : > { %v2887_v62 = vadd.f32 %v4814_v54, %v2869_v24 }
 0x1ce   : > { %v2900_v59 = vmax.f32 %v2889_v45, 0.0  ;;  %v2870_v6 = vld [vmem:[#allocation2 + $0x48] sm:$0xff] }
 0x1cf   : > { %v2898_v58 = vmax.f32 %v2887_v62, 0.0  ;;  %v2888_v12 = vadd.f32 %v4814_v54, %v2870_v6 }
 0x1d0   : > { %v3292_v2 = vpack.c.bf16 %v2900_v59, %v2900_v59 }
 0x1d1   : > { %v3290_v18 = vpack.c.bf16 %v2898_v58, %v2898_v58  ;;  %v2899_v57 = vmax.f32 %v2888_v12, 0.0 }
 0x1d2   : > { %2957 = vst.msk [vmem:[%s4832_s24 + $0x28] sm:$0xf] %vm2946_vm9, %v3292_v2 }
 0x1d3   : > { %2955 = vst.msk [vmem:[%s4832_s24 + $0x20] sm:$0xf] %vm2946_vm9, %v3290_v18  ;;  %v3291_v19 = vpack.c.bf16 %v2899_v57, %v2899_v57 }
 0x1d5   : > { %2956 = vst.msk [vmem:[%s4832_s24 + $0x24] sm:$0xf] %vm2946_vm9, %v3291_v19 }
 0x1d6 PF: > { %s13_s16 = sadd.s32 1, %s3910_s16   ;;  %s4914_s12 = smov %s3902_s14 }
 0x1d7   : > { %p10_p7 = scmp.ge.s32.totalorder %s13_s16, 10   ;;  %s4915_s13 = smov %s3906_s15 }
 0x1d8   : > { %s4916_s14 = smov %s4919_s17  ;;  %s4917_s15 = smov %s4923_s18 }
 0x1d9   :  { %12 = sbr.rel (!%p10_p7) target bundleno = 3 (0x3), region = 88 }

</bundles_post_ra>
